<compile_context>
chip_gen: v5e
topology: v5e:2x2
jax: 0.10.0
libtpu: 0.0.40
codegen_flags: <defaults>
</compile_context>

<pallas_src>
import functools

import jax
import jax.numpy as jnp
from jax.experimental import pallas as pl
from jax.experimental.pallas import tpu as pltpu

DIM = 1024
DEPTH = 3
HEADS = 16
DIM_HEAD = 64
INNER = HEADS * DIM_HEAD           # 1024
MLP_DIM = 2048
FF_TILE = 1024                     # MLP_DIM reduction tile
NUM_CLASSES = 1000
NUM_CLASSES_PAD = 1024             # lane-dense padded head output
PATCH = 4
CHANNELS = 1
IMAGE_SIZE = 32
PATCH_DIM = CHANNELS * PATCH * PATCH  # 16
LN_EPS = 1e-5


def _round_up(x, m):
    return (x + m - 1) // m * m


def _ln(x, g, b, eps=LN_EPS):
    """In-kernel LayerNorm on a (rows, features) f32 value; g/b are (1, features)."""
    mean = jnp.mean(x, axis=-1, keepdims=True)
    var = jnp.mean(jnp.square(x - mean), axis=-1, keepdims=True)
    return (x - mean) * jax.lax.rsqrt(var + eps) * g + b


# ----------------------------- Pallas kernels ------------------------------

def _patch_embed_kernel(x_ref, g1_ref, b1_ref, w_ref, b_ref, g2_ref, b2_ref,
                        pos_ref, o_ref):
    """LN(patch_dim) -> Linear(patch_dim, dim) -> LN(dim) -> + pos_emb."""
    x = x_ref[...]
    xn = _ln(x, g1_ref[...], b1_ref[...])
    h = jnp.dot(xn.astype(jnp.bfloat16), w_ref[...],
                preferred_element_type=jnp.float32) + b_ref[...]
    hn = _ln(h, g2_ref[...], b2_ref[...])
    o_ref[...] = hn + pos_ref[...]


def _ln_kernel(x_ref, g_ref, b_ref, o_ref):
    o_ref[...] = _ln(x_ref[...], g_ref[...], b_ref[...])


def _head_kernel(x_ref, g_ref, b_ref, w_ref, o_ref):
    """mlp_head: LN(dim) -> Linear(dim, num_classes_pad, bias=False)."""
    xn = _ln(x_ref[...], g_ref[...], b_ref[...])
    o_ref[...] = jnp.dot(xn.astype(jnp.bfloat16), w_ref[...],
                         preferred_element_type=jnp.float32)


def _ff_kernel(x_ref, lng_ref, lnb_ref, w1_ref, b1_ref, w2_ref, b2_ref, o_ref):
    """Fused FF: LN -> W1 tile -> GELU -> W2 tile, accumulated over the MLP dim.

    Output block index is constant across the grid -> o_ref is a resident f32
    accumulator; residual x and b2 are added once at step 0.
    """
    j = pl.program_id(0)
    x = x_ref[...]
    xn = _ln(x, lng_ref[...], lnb_ref[...])
    h = jnp.dot(xn.astype(jnp.bfloat16), w1_ref[...],
                preferred_element_type=jnp.float32) + b1_ref[...]
    h = jax.nn.gelu(h, approximate=False)          # exact erf GELU == nn.GELU()
    part = jnp.dot(h.astype(jnp.bfloat16), w2_ref[...],
                   preferred_element_type=jnp.float32)

    @pl.when(j == 0)
    def _():
        o_ref[...] = x + b2_ref[...]               # residual + bias, added once

    o_ref[...] += part


def _attn_block_kernel(*refs, has_context):
    """Fused NaViT attention block for one batch element (all heads).

    LN(x) -> q/kv projections -> RMS q/k-norm -> masked softmax over all heads
    -> lane-dense (Nq, H*Dh) slab -> Wo projection -> + residual.
    """
    if has_context:
        (x_ref, ctx_ref, mask_ref, lng_ref, lnb_ref, wq_ref, wkv_ref,
         gq_ref, gk_ref, wo_ref, o_ref) = refs
    else:
        (x_ref, mask_ref, lng_ref, lnb_ref, wq_ref, wkv_ref,
         gq_ref, gk_ref, wo_ref, o_ref) = refs
        ctx_ref = None

    x = x_ref[...]                                             # (Nq, D) f32
    xn = _ln(x, lng_ref[...], lnb_ref[...])

    q_slab = jnp.dot(xn.astype(jnp.bfloat16), wq_ref[...],
                     preferred_element_type=jnp.float32)       # (Nq, INNER)
    kv_src = ctx_ref[...] if has_context else xn               # (Nk, D)
    kv_slab = jnp.dot(kv_src.astype(jnp.bfloat16), wkv_ref[...],
                      preferred_element_type=jnp.float32)      # (Nk, 2*INNER)

    nq = x.shape[0]
    nk = kv_src.shape[0]
    q = jnp.transpose(q_slab.reshape(nq, HEADS, DIM_HEAD), (1, 0, 2))   # (H,Nq,Dh)
    k = jnp.transpose(kv_slab[:, :INNER].reshape(nk, HEADS, DIM_HEAD), (1, 0, 2))
    v = jnp.transpose(kv_slab[:, INNER:].reshape(nk, HEADS, DIM_HEAD), (1, 0, 2))

    # NaViT RMSNorm on q/k: F.normalize(x, dim=-1) * sqrt(dim_head) * gamma
    # (no extra 1/sqrt(d) applied to the dots, matching the reference).
    scale = float(DIM_HEAD) ** 0.5
    gq = gq_ref[...]                                           # (H, 1, Dh)
    gk = gk_ref[...]
    qn = q * jax.lax.rsqrt(jnp.maximum(jnp.sum(q * q, -1, keepdims=True), 1e-24))
    kn = k * jax.lax.rsqrt(jnp.maximum(jnp.sum(k * k, -1, keepdims=True), 1e-24))
    qn = qn * (scale * gq)
    kn = kn * (scale * gk)

    dots = jax.lax.dot_general(
        qn.astype(jnp.bfloat16), kn.astype(jnp.bfloat16),
        (((2,), (2,)), ((0,), (0,))),
        preferred_element_type=jnp.float32)                    # (H, Nq, Nk)

    mask = mask_ref[...]                                       # (Nq, Nk), 1.0 = keep
    neg = -jnp.finfo(jnp.float32).max
    dots = jnp.where(mask[None, :, :] > 0, dots, neg)
    dots = dots - jnp.max(dots, axis=-1, keepdims=True)
    p = jnp.exp(dots)
    p = p * pl.reciprocal(jnp.sum(p, axis=-1, keepdims=True), approx=True)

    out = jax.lax.dot_general(
        p.astype(jnp.bfloat16), v.astype(jnp.bfloat16),
        (((2,), (1,)), ((0,), (0,))),
        preferred_element_type=jnp.float32)                    # (H, Nq, Dh)
    out_slab = jnp.transpose(out, (1, 0, 2)).reshape(nq, INNER)  # lane-dense (Nq, 1024)

    o = jnp.dot(out_slab.astype(jnp.bfloat16), wo_ref[...],
                preferred_element_type=jnp.float32) + x        # + residual
    o_ref[...] = o


# ------------------------------ kernel wrappers -----------------------------

def pallas_patch_embed(x2d, pos2d, p):
    M = x2d.shape[0]
    return pl.pallas_call(
        _patch_embed_kernel,
        out_shape=jax.ShapeDtypeStruct((M, DIM), jnp.float32),
        grid_spec=pltpu.PrefetchScalarGridSpec(
            num_scalar_prefetch=0, grid=(1,),
            in_specs=[
                pl.BlockSpec((M, PATCH_DIM), lambda i: (0, 0)),
                pl.BlockSpec((1, PATCH_DIM), lambda i: (0, 0)),
                pl.BlockSpec((1, PATCH_DIM), lambda i: (0, 0)),
                pl.BlockSpec((PATCH_DIM, DIM), lambda i: (0, 0)),
                pl.BlockSpec((1, DIM), lambda i: (0, 0)),
                pl.BlockSpec((1, DIM), lambda i: (0, 0)),
                pl.BlockSpec((1, DIM), lambda i: (0, 0)),
                pl.BlockSpec((M, DIM), lambda i: (0, 0)),
            ],
            out_specs=pl.BlockSpec((M, DIM), lambda i: (0, 0))),
        compiler_params=pltpu.CompilerParams(dimension_semantics=("arbitrary",)),
    )(x2d, p["pe_ln1_g"], p["pe_ln1_b"], p["pe_w"], p["pe_b"],
      p["pe_ln2_g"], p["pe_ln2_b"], pos2d)


def pallas_layernorm(x2d, g, b):
    M, D = x2d.shape
    return pl.pallas_call(
        _ln_kernel,
        out_shape=jax.ShapeDtypeStruct((M, D), jnp.float32),
        grid_spec=pltpu.PrefetchScalarGridSpec(
            num_scalar_prefetch=0, grid=(1,),
            in_specs=[pl.BlockSpec((M, D), lambda i: (0, 0)),
                      pl.BlockSpec((1, D), lambda i: (0, 0)),
                      pl.BlockSpec((1, D), lambda i: (0, 0))],
            out_specs=pl.BlockSpec((M, D), lambda i: (0, 0))),
        compiler_params=pltpu.CompilerParams(dimension_semantics=("arbitrary",)),
    )(x2d, g, b)


def pallas_head(x2d, p):
    M, D = x2d.shape
    return pl.pallas_call(
        _head_kernel,
        out_shape=jax.ShapeDtypeStruct((M, NUM_CLASSES_PAD), jnp.float32),
        grid_spec=pltpu.PrefetchScalarGridSpec(
            num_scalar_prefetch=0, grid=(1,),
            in_specs=[pl.BlockSpec((M, D), lambda i: (0, 0)),
                      pl.BlockSpec((1, D), lambda i: (0, 0)),
                      pl.BlockSpec((1, D), lambda i: (0, 0)),
                      pl.BlockSpec((D, NUM_CLASSES_PAD), lambda i: (0, 0))],
            out_specs=pl.BlockSpec((M, NUM_CLASSES_PAD), lambda i: (0, 0))),
        compiler_params=pltpu.CompilerParams(dimension_semantics=("arbitrary",)),
    )(x2d, p["head_ln_g"], p["head_ln_b"], p["head_w"])


def pallas_ff_block(x2d, p):
    M, D = x2d.shape
    n_mid = MLP_DIM // FF_TILE
    return pl.pallas_call(
        _ff_kernel,
        out_shape=jax.ShapeDtypeStruct((M, D), jnp.float32),
        grid_spec=pltpu.PrefetchScalarGridSpec(
            num_scalar_prefetch=0, grid=(n_mid,),
            in_specs=[
                pl.BlockSpec((M, D), lambda j: (0, 0)),
                pl.BlockSpec((1, D), lambda j: (0, 0)),
                pl.BlockSpec((1, D), lambda j: (0, 0)),
                pl.BlockSpec((D, FF_TILE), lambda j: (0, j)),
                pl.BlockSpec((1, FF_TILE), lambda j: (0, j)),
                pl.BlockSpec((FF_TILE, D), lambda j: (j, 0)),
                pl.BlockSpec((1, D), lambda j: (0, 0)),
            ],
            out_specs=pl.BlockSpec((M, D), lambda j: (0, 0))),
        compiler_params=pltpu.CompilerParams(dimension_semantics=("arbitrary",)),
    )(x2d, p["ln_g"], p["ln_b"], p["w1"], p["b1"], p["w2"], p["b2"])


def pallas_attn_block(x, mask, p, context=None):
    """x:(B,Nq,D) f32; mask:(B,Nq,Nk) f32 (1=keep); context:(B,Nk,D) f32 or None."""
    B, Nq, D = x.shape
    has_ctx = context is not None
    Nk = context.shape[1] if has_ctx else Nq

    bmap = lambda b: (b, 0, 0)
    zmap = lambda b: (0, 0)
    gmap = lambda b: (0, 0, 0)

    in_specs = [pl.BlockSpec((None, Nq, D), bmap)]
    args = [x]
    if has_ctx:
        in_specs.append(pl.BlockSpec((None, Nk, D), bmap))
        args.append(context)
    in_specs += [
        pl.BlockSpec((None, Nq, Nk), bmap),
        pl.BlockSpec((1, D), zmap),
        pl.BlockSpec((1, D), zmap),
        pl.BlockSpec((D, INNER), zmap),
        pl.BlockSpec((D, 2 * INNER), zmap),
        pl.BlockSpec((HEADS, 1, DIM_HEAD), gmap),
        pl.BlockSpec((HEADS, 1, DIM_HEAD), gmap),
        pl.BlockSpec((INNER, D), zmap),
    ]
    args += [mask, p["norm_g"], p["norm_b"], p["wq"], p["wkv"],
             p["gq"], p["gk"], p["wo"]]

    return pl.pallas_call(
        functools.partial(_attn_block_kernel, has_context=has_ctx),
        out_shape=jax.ShapeDtypeStruct((B, Nq, D), jnp.float32),
        grid_spec=pltpu.PrefetchScalarGridSpec(
            num_scalar_prefetch=0, grid=(B,),
            in_specs=in_specs,
            out_specs=pl.BlockSpec((None, Nq, D), bmap)),
        compiler_params=pltpu.CompilerParams(dimension_semantics=("parallel",)),
    )(*args)


# ------------------------------ model forward -------------------------------

def navit_forward(params, batched_images):
    # ---- pack variable-resolution images into padded token sequences (host glue) ----
    num_images, seqs, poss, ids = [], [], [], []
    for images in batched_images:
        num_images.append(len(images))
        s_list, p_list, i_list = [], [], []
        for image_id, image in enumerate(images):
            C, H, W = image.shape
            assert C == CHANNELS and H % PATCH == 0 and W % PATCH == 0
            ph, pw = H // PATCH, W // PATCH
            seq = image.reshape(C, ph, PATCH, pw, PATCH).transpose(1, 3, 0, 2, 4)
            seq = seq.reshape(ph * pw, C * PATCH * PATCH)   # 'c (h p1)(w p2)->(h w)(c p1 p2)'
            hh, ww = jnp.meshgrid(jnp.arange(ph), jnp.arange(pw), indexing="ij")
            pos = jnp.stack([hh, ww], axis=-1).reshape(ph * pw, 2)
            s_list.append(seq)
            p_list.append(pos)
            i_list.append(jnp.full((ph * pw,), image_id, dtype=jnp.int32))
        seqs.append(jnp.concatenate(s_list, 0))
        poss.append(jnp.concatenate(p_list, 0))
        ids.append(jnp.concatenate(i_list, 0))

    lengths = [int(s.shape[0]) for s in seqs]
    B = len(seqs)
    Np = _round_up(max(lengths), 16)    # 16-row padding (bf16 sublane tile)
    patches = jnp.stack([jnp.pad(s, ((0, Np - s.shape[0]), (0, 0))) for s in seqs])
    patch_pos = jnp.stack([jnp.pad(pp, ((0, Np - pp.shape[0]), (0, 0))) for pp in poss])
    image_ids = jnp.stack([jnp.pad(ii, (0, Np - ii.shape[0])) for ii in ids])
    key_valid = jnp.arange(Np)[None, :] < jnp.array(lengths)[:, None]            # (B, Np)
    attn_mask = ((image_ids[:, :, None] == image_ids[:, None, :])
                 & key_valid[:, None, :]).astype(jnp.float32)                    # (B, Np, Np)

    # factorized 2-D absolute positional embedding (gathered once, added in-kernel)
    pos_emb = params["pos_h"][patch_pos[..., 0]] + params["pos_w"][patch_pos[..., 1]]

    # ---- patch embedding: LN -> Linear -> LN -> + pos (one fused kernel) ----
    x = pallas_patch_embed(patches.reshape(B * Np, PATCH_DIM).astype(jnp.float32),
                           pos_emb.reshape(B * Np, DIM).astype(jnp.float32), params)
    x = x.reshape(B, Np, DIM)
    # emb_dropout: identity in eval mode

    # ---- transformer (depth=3): fused attention block + fused FF block ----
    for layer in params["layers"]:
        x = pallas_attn_block(x, attn_mask, layer["attn"])                       # + residual inside
        x = pallas_ff_block(x.reshape(B * Np, DIM), layer["ff"]).reshape(B, Np, DIM)

    x = pallas_layernorm(x.reshape(B * Np, DIM),
                         params["final_ln_g"], params["final_ln_b"]).reshape(B, Np, DIM)

    # ---- attention pooling ----
    Qp = _round_up(max(num_images), 16)
    queries = jnp.broadcast_to(params["pool_q"][None, None, :], (B, Qp, DIM)).astype(jnp.float32)
    iid = jnp.arange(Qp)
    pool_mask = ((iid[None, :, None] == image_ids[:, None, :])
                 & key_valid[:, None, :]).astype(jnp.float32)                    # (B, Qp, Np)
    pooled = pallas_attn_block(queries, pool_mask, params["attn_pool"], context=x)
    pooled = pooled.reshape(B * Qp, DIM)

    # ---- mlp head: LN + Linear(no bias), lane-padded to 1024 then sliced ----
    logits_all = pallas_head(pooled, params)[:, :NUM_CLASSES]

    # x[is_images] — num_images is static python, so selection indices are static
    sel = [b * Qp + q for b in range(B) for q in range(num_images[b])]
    return logits_all[jnp.array(sel, dtype=jnp.int32)]


# ------------------------------ parameter init ------------------------------

def init_params(key):
    keys = iter(jax.random.split(key, 64))

    def nrm_bf16(shape, scale=0.02):
        return (scale * jax.random.normal(next(keys), shape, jnp.float32)).astype(jnp.bfloat16)

    def nrm_f32(shape, scale=0.02):
        return scale * jax.random.normal(next(keys), shape, jnp.float32)

    def ones_row(d):
        return jnp.ones((1, d), jnp.float32)

    def zeros_row(d):
        return jnp.zeros((1, d), jnp.float32)

    def attn_params():
        return {
            "norm_g": ones_row(DIM),
            "norm_b": zeros_row(DIM),
            "gq": jnp.ones((HEADS, 1, DIM_HEAD), jnp.float32),
            "gk": jnp.ones((HEADS, 1, DIM_HEAD), jnp.float32),
            "wq": nrm_bf16((DIM, INNER)),
            "wkv": nrm_bf16((DIM, 2 * INNER)),
            "wo": nrm_bf16((INNER, DIM)),
        }

    head_w = nrm_f32((DIM, NUM_CLASSES))
    head_w = jnp.pad(head_w, ((0, 0), (0, NUM_CLASSES_PAD - NUM_CLASSES))).astype(jnp.bfloat16)

    params = {
        "pe_ln1_g": ones_row(PATCH_DIM),
        "pe_ln1_b": zeros_row(PATCH_DIM),
        "pe_w": nrm_bf16((PATCH_DIM, DIM)),
        "pe_b": zeros_row(DIM),
        "pe_ln2_g": ones_row(DIM),
        "pe_ln2_b": zeros_row(DIM),
        "pos_h": nrm_f32((IMAGE_SIZE // PATCH, DIM)),
        "pos_w": nrm_f32((IMAGE_SIZE // PATCH, DIM)),
        "layers": [],
        "final_ln_g": ones_row(DIM),
        "final_ln_b": zeros_row(DIM),
        "pool_q": nrm_f32((DIM,)),
        "attn_pool": None,
        "head_ln_g": ones_row(DIM),
        "head_ln_b": zeros_row(DIM),
        "head_w": head_w,
    }
    for _ in range(DEPTH):
        params["layers"].append({
            "attn": attn_params(),
            "ff": {
                "ln_g": ones_row(DIM),
                "ln_b": zeros_row(DIM),
                "w1": nrm_bf16((DIM, MLP_DIM)),
                "b1": zeros_row(MLP_DIM),
                "w2": nrm_bf16((MLP_DIM, DIM)),
                "b2": zeros_row(DIM),
            },
        })
    params["attn_pool"] = attn_params()
    return params


# ---------------------------------- main ------------------------------------

if __name__ == "__main__":
    key = jax.random.PRNGKey(0)
    kp, k1, k2, k3 = jax.random.split(key, 4)
    params = init_params(kp)

    # variable-resolution, channels=1 images (all dims divisible by patch size 4, <= 32)
    img_a = jax.random.normal(k1, (1, 16, 16), jnp.float32)
    img_b = jax.random.normal(k2, (1, 8, 8), jnp.float32)
    img_c = jax.random.normal(k3, (1, 12, 12), jnp.float32)
    batched_images = [[img_a, img_b], [img_c]]   # batch of 2 sequences, 3 images total

    logits = navit_forward(params, batched_images)
    logits = jax.block_until_ready(logits)
    assert logits.shape == (3, NUM_CLASSES), logits.shape
    assert bool(jnp.all(jnp.isfinite(logits)))
    print("KERNEL_OK")
</pallas_src>

<mosaic_0001>
module attributes {stable_mosaic.version = 11 : i64} {
  func.func @_patch_embed_kernel(%arg0: i32, %arg1: memref<64x16xf32, #tpu.memory_space<vmem>>, %arg2: memref<1x16xf32, #tpu.memory_space<vmem>>, %arg3: memref<1x16xf32, #tpu.memory_space<vmem>>, %arg4: memref<16x1024xbf16, #tpu.memory_space<vmem>>, %arg5: memref<1x1024xf32, #tpu.memory_space<vmem>>, %arg6: memref<1x1024xf32, #tpu.memory_space<vmem>>, %arg7: memref<1x1024xf32, #tpu.memory_space<vmem>>, %arg8: memref<64x1024xf32, #tpu.memory_space<vmem>>, %arg9: memref<64x1024xf32, #tpu.memory_space<vmem>>) attributes {dimension_semantics = [#tpu.dimension_semantics<arbitrary>], iteration_bounds = array<i64: 1>, scalar_prefetch = 0 : i64, scratch_operands = 0 : i64, tpu.core_type = #tpu.core_type<tc>, window_params = [{pipeline_mode = #tpu.pipeline_mode<synchronous>, transform_indices = @transform_0, window_bounds = array<i64: 64, 16>}, {pipeline_mode = #tpu.pipeline_mode<synchronous>, transform_indices = @transform_1, window_bounds = array<i64: 1, 16>}, {pipeline_mode = #tpu.pipeline_mode<synchronous>, transform_indices = @transform_2, window_bounds = array<i64: 1, 16>}, {pipeline_mode = #tpu.pipeline_mode<synchronous>, transform_indices = @transform_3, window_bounds = array<i64: 16, 1024>}, {pipeline_mode = #tpu.pipeline_mode<synchronous>, transform_indices = @transform_4, window_bounds = array<i64: 1, 1024>}, {pipeline_mode = #tpu.pipeline_mode<synchronous>, transform_indices = @transform_5, window_bounds = array<i64: 1, 1024>}, {pipeline_mode = #tpu.pipeline_mode<synchronous>, transform_indices = @transform_6, window_bounds = array<i64: 1, 1024>}, {pipeline_mode = #tpu.pipeline_mode<synchronous>, transform_indices = @transform_7, window_bounds = array<i64: 64, 1024>}, {pipeline_mode = #tpu.pipeline_mode<synchronous>, transform_indices = @transform_8, window_bounds = array<i64: 64, 1024>}]} {
    %c0 = arith.constant 0 : index
    %c0_0 = arith.constant 0 : index
    %0 = vector.load %arg1[%c0, %c0_0] : memref<64x16xf32, #tpu.memory_space<vmem>>, vector<64x16xf32>
    %c0_1 = arith.constant 0 : index
    %c0_2 = arith.constant 0 : index
    %1 = vector.load %arg2[%c0_1, %c0_2] : memref<1x16xf32, #tpu.memory_space<vmem>>, vector<1x16xf32>
    %c0_3 = arith.constant 0 : index
    %c0_4 = arith.constant 0 : index
    %2 = vector.load %arg3[%c0_3, %c0_4] : memref<1x16xf32, #tpu.memory_space<vmem>>, vector<1x16xf32>
    %cst = arith.constant dense<0.000000e+00> : vector<64xf32>
    %3 = vector.multi_reduction <add>, %0, %cst [1] : vector<64x16xf32> to vector<64xf32>
    %4 = vector.shape_cast %3 : vector<64xf32> to vector<64x1xf32>
    %cst_5 = arith.constant 1.600000e+01 : f32
    %5 = vector.broadcast %cst_5 : f32 to vector<64x1xf32>
    %6 = arith.divf %4, %5 : vector<64x1xf32>
    %7 = vector.broadcast %6 : vector<64x1xf32> to vector<64x16xf32>
    %8 = arith.subf %0, %7 : vector<64x16xf32>
    %9 = arith.mulf %8, %8 : vector<64x16xf32>
    %cst_6 = arith.constant dense<0.000000e+00> : vector<64xf32>
    %10 = vector.multi_reduction <add>, %9, %cst_6 [1] : vector<64x16xf32> to vector<64xf32>
    %11 = vector.shape_cast %10 : vector<64xf32> to vector<64x1xf32>
    %cst_7 = arith.constant 1.600000e+01 : f32
    %12 = vector.broadcast %cst_7 : f32 to vector<64x1xf32>
    %13 = arith.divf %11, %12 : vector<64x1xf32>
    %14 = vector.broadcast %6 : vector<64x1xf32> to vector<64x16xf32>
    %15 = arith.subf %0, %14 : vector<64x16xf32>
    %cst_8 = arith.constant 9.99999974E-6 : f32
    %16 = vector.broadcast %cst_8 : f32 to vector<64x1xf32>
    %17 = arith.addf %13, %16 : vector<64x1xf32>
    %18 = math.rsqrt %17 : vector<64x1xf32>
    %19 = vector.broadcast %18 : vector<64x1xf32> to vector<64x16xf32>
    %20 = arith.mulf %15, %19 : vector<64x16xf32>
    %21 = vector.broadcast %1 : vector<1x16xf32> to vector<64x16xf32>
    %22 = arith.mulf %20, %21 : vector<64x16xf32>
    %23 = vector.broadcast %2 : vector<1x16xf32> to vector<64x16xf32>
    %24 = arith.addf %22, %23 : vector<64x16xf32>
    %25 = arith.truncf %24 : vector<64x16xf32> to vector<64x16xbf16>
    %c0_9 = arith.constant 0 : index
    %c0_10 = arith.constant 0 : index
    %26 = vector.load %arg4[%c0_9, %c0_10] : memref<16x1024xbf16, #tpu.memory_space<vmem>>, vector<16x1024xbf16>
    %cst_11 = arith.constant dense<0.000000e+00> : vector<64x1024xf32>
    %27 = tpu.matmul %25, %26, %cst_11 {dimension_numbers = #tpu.dot_dimension_numbers<[1], [0], [0], [1], [0, 0, 1, 1], [], []>} : vector<64x16xbf16>, vector<16x1024xbf16>, vector<64x1024xf32> -> vector<64x1024xf32>
    %c0_12 = arith.constant 0 : index
    %c0_13 = arith.constant 0 : index
    %28 = vector.load %arg5[%c0_12, %c0_13] : memref<1x1024xf32, #tpu.memory_space<vmem>>, vector<1x1024xf32>
    %29 = vector.broadcast %28 : vector<1x1024xf32> to vector<64x1024xf32>
    %30 = arith.addf %27, %29 : vector<64x1024xf32>
    %c0_14 = arith.constant 0 : index
    %c0_15 = arith.constant 0 : index
    %31 = vector.load %arg6[%c0_14, %c0_15] : memref<1x1024xf32, #tpu.memory_space<vmem>>, vector<1x1024xf32>
    %c0_16 = arith.constant 0 : index
    %c0_17 = arith.constant 0 : index
    %32 = vector.load %arg7[%c0_16, %c0_17] : memref<1x1024xf32, #tpu.memory_space<vmem>>, vector<1x1024xf32>
    %cst_18 = arith.constant dense<0.000000e+00> : vector<64xf32>
    %33 = vector.multi_reduction <add>, %30, %cst_18 [1] : vector<64x1024xf32> to vector<64xf32>
    %34 = vector.shape_cast %33 : vector<64xf32> to vector<64x1xf32>
    %cst_19 = arith.constant 1.024000e+03 : f32
    %35 = vector.broadcast %cst_19 : f32 to vector<64x1xf32>
    %36 = arith.divf %34, %35 : vector<64x1xf32>
    %37 = vector.broadcast %36 : vector<64x1xf32> to vector<64x1024xf32>
    %38 = arith.subf %30, %37 : vector<64x1024xf32>
    %39 = arith.mulf %38, %38 : vector<64x1024xf32>
    %cst_20 = arith.constant dense<0.000000e+00> : vector<64xf32>
    %40 = vector.multi_reduction <add>, %39, %cst_20 [1] : vector<64x1024xf32> to vector<64xf32>
    %41 = vector.shape_cast %40 : vector<64xf32> to vector<64x1xf32>
    %cst_21 = arith.constant 1.024000e+03 : f32
    %42 = vector.broadcast %cst_21 : f32 to vector<64x1xf32>
    %43 = arith.divf %41, %42 : vector<64x1xf32>
    %44 = vector.broadcast %36 : vector<64x1xf32> to vector<64x1024xf32>
    %45 = arith.subf %30, %44 : vector<64x1024xf32>
    %cst_22 = arith.constant 9.99999974E-6 : f32
    %46 = vector.broadcast %cst_22 : f32 to vector<64x1xf32>
    %47 = arith.addf %43, %46 : vector<64x1xf32>
    %48 = math.rsqrt %47 : vector<64x1xf32>
    %49 = vector.broadcast %48 : vector<64x1xf32> to vector<64x1024xf32>
    %50 = arith.mulf %45, %49 : vector<64x1024xf32>
    %51 = vector.broadcast %31 : vector<1x1024xf32> to vector<64x1024xf32>
    %52 = arith.mulf %50, %51 : vector<64x1024xf32>
    %53 = vector.broadcast %32 : vector<1x1024xf32> to vector<64x1024xf32>
    %54 = arith.addf %52, %53 : vector<64x1024xf32>
    %c0_23 = arith.constant 0 : index
    %c0_24 = arith.constant 0 : index
    %55 = vector.load %arg8[%c0_23, %c0_24] : memref<64x1024xf32, #tpu.memory_space<vmem>>, vector<64x1024xf32>
    %56 = arith.addf %54, %55 : vector<64x1024xf32>
    %c0_25 = arith.constant 0 : index
    %c0_26 = arith.constant 0 : index
    %57 = vector.load %arg9[%c0_25, %c0_26] : memref<64x1024xf32, #tpu.memory_space<vmem>>, vector<64x1024xf32>
    tpu.vector_store %arg9[%c0_25, %c0_26], %56 {strides = array<i32>} : memref<64x1024xf32, #tpu.memory_space<vmem>>, vector<64x1024xf32>,
    return
  }
  func.func @transform_0(%arg0: i32) -> (i32, i32) {
    %c0_i32 = arith.constant 0 : i32
    %c0_i32_0 = arith.constant 0 : i32
    %c0_i32_1 = arith.constant 0 : i32
    return %c0_i32, %c0_i32_0 : i32, i32
  }
  func.func @transform_1(%arg0: i32) -> (i32, i32) {
    %c0_i32 = arith.constant 0 : i32
    %c0_i32_0 = arith.constant 0 : i32
    %c0_i32_1 = arith.constant 0 : i32
    return %c0_i32, %c0_i32_0 : i32, i32
  }
  func.func @transform_2(%arg0: i32) -> (i32, i32) {
    %c0_i32 = arith.constant 0 : i32
    %c0_i32_0 = arith.constant 0 : i32
    %c0_i32_1 = arith.constant 0 : i32
    return %c0_i32, %c0_i32_0 : i32, i32
  }
  func.func @transform_3(%arg0: i32) -> (i32, i32) {
    %c0_i32 = arith.constant 0 : i32
    %c0_i32_0 = arith.constant 0 : i32
    %c0_i32_1 = arith.constant 0 : i32
    return %c0_i32, %c0_i32_0 : i32, i32
  }
  func.func @transform_4(%arg0: i32) -> (i32, i32) {
    %c0_i32 = arith.constant 0 : i32
    %c0_i32_0 = arith.constant 0 : i32
    %c0_i32_1 = arith.constant 0 : i32
    return %c0_i32, %c0_i32_0 : i32, i32
  }
  func.func @transform_5(%arg0: i32) -> (i32, i32) {
    %c0_i32 = arith.constant 0 : i32
    %c0_i32_0 = arith.constant 0 : i32
    %c0_i32_1 = arith.constant 0 : i32
    return %c0_i32, %c0_i32_0 : i32, i32
  }
  func.func @transform_6(%arg0: i32) -> (i32, i32) {
    %c0_i32 = arith.constant 0 : i32
    %c0_i32_0 = arith.constant 0 : i32
    %c0_i32_1 = arith.constant 0 : i32
    return %c0_i32, %c0_i32_0 : i32, i32
  }
  func.func @transform_7(%arg0: i32) -> (i32, i32) {
    %c0_i32 = arith.constant 0 : i32
    %c0_i32_0 = arith.constant 0 : i32
    %c0_i32_1 = arith.constant 0 : i32
    return %c0_i32, %c0_i32_0 : i32, i32
  }
  func.func @transform_8(%arg0: i32) -> (i32, i32) {
    %c0_i32 = arith.constant 0 : i32
    %c0_i32_0 = arith.constant 0 : i32
    %c0_i32_1 = arith.constant 0 : i32
    return %c0_i32, %c0_i32_0 : i32, i32
  }
}

</mosaic_0001>

<bundles_post_ra>
// kernel: tpu_custom_call.1
= control target key start
LH: loop header
LB: loop body
LE: loop exit
PB: predicated region body
PF: predicated region fallthrough
CT: control target
= control target key end

     0   :  { %13 = vsyncpa [#allocation3], 0  ;;  %s2942_s0 = inlined_call_operand.vmem [shape: f32[64,16], index: 0, kind: input, shape index: {}]   ;;  %s2943_s1 = inlined_call_operand.vmem [shape: f32[1,16], index: 1, kind: input, shape index: {}]   ;;  %s2944_s2 = inlined_call_operand.vmem [shape: f32[1,16], index: 2, kind: input, shape index: {}]   ;;  %s2945_s3 = inlined_call_operand.vmem [shape: bf16[16,1024], index: 3, kind: input, shape index: {}]   ;;  %s2946_s4 = inlined_call_operand.vmem [shape: f32[1,1024], index: 4, kind: input, shape index: {}]   ;;  %s2947_s5 = inlined_call_operand.vmem [shape: f32[1,1024], index: 5, kind: input, shape index: {}]   ;;  %s2948_s6 = inlined_call_operand.hbm [shape: f32[1,1024], index: 6, kind: input, shape index: {}]   ;;  %s2949_s7 = inlined_call_operand.hbm [shape: f32[64,1024], index: 7, kind: input, shape index: {}]   ;;  %s2950_s8 = inlined_call_operand.hbm [shape: f32[64,1024], index: 8, kind: output, shape index: {}]  }
   0x1   :  { %14 = vsyncpa [#allocation6], 0 }
   0x2   :  { %15 = vsyncpa [#allocation4], 0  ;;  %s33_s29 = sshll.u32 %s2948_s6, 4  ;;  %s1609_s30 = smov [#allocation2]   ;;  %s34_s29 = int_to_ptr.hbm [resolvable:$true] %s33_s29 }
   0x3   :  { %s35_s9 = sshll.u32 %s1609_s30, 4  ;;  %s43_s12 = sshll.u32 %s2949_s7, 4  ;;  %s36_s9 = int_to_ptr.vmem [resolvable:$true] %s35_s9  ;;  %s44_s12 = int_to_ptr.hbm [resolvable:$true] %s43_s12 }
   0x4   :  { %38 = dma.hbm_to_vmem [thread:$0]  %s34_s29, 128, %s36_s9, [#allocation3]  }
   0x5   :  { %s1610_s13 = smov [#allocation5]   ;;  %s1611_s15 = smov 1024  }
   0x6   :  { %s45_s14 = sshll.u32 %s1610_s13, 4  ;;  %s1612_s16 = smov 64   ;;  %s46_s14 = int_to_ptr.vmem [resolvable:$true] %s45_s14 }
   0x7   :  { %51 = dma.hbm_to_vmem [thread:$0]  %s44_s12, 8192, %s46_s14, [#allocation6], %s1611_s15, %s1611_s15, %s1612_s16  }
   0x8   :  { %1603 = dma.done.wait [#allocation3], 128  }
   0x9   :  { %1604 = vsyncadd [#allocation3], 4294967168 }
   0xa   :  { %1605 = dma.done.wait [#allocation6], 8192  }
   0xb   :  { %1606 = vsyncadd [#allocation6], 4294959104  ;;  %vm71_vm0 = vcmask 130048   ;;  %v65_v0 = vld [vmem:[%s2942_s0 + $0x20] sm:$0xff]  ;;  %v63_v1 = vld [vmem:[%s2942_s0 + $0x10] sm:$0xff]  ;;  %v1613_v14 = vmov 16.0  }
   0xc   :  { %v61_v2 = vld [vmem:[%s2942_s0] sm:$0xff]  ;;  %v84_v3 = vsel %vm71_vm0, %v65_v0, 0.0  ;;  %v78_v4 = vsel %vm71_vm0, %v63_v1, 0.0  ;;  %v66_v6 = vld [vmem:[%s2942_s0 + $0x28] sm:$0xff]  ;;  %v64_v7 = vld [vmem:[%s2942_s0 + $0x18] sm:$0xff]  ;;  %1495 = vrcp.f32 %v1613_v14  ;;  %s1400_s24 = sshll.u32 %s2950_s8, 4  ;;  %s1401_s24 = int_to_ptr.hbm [resolvable:$true] %s1400_s24 }
   0xd   :  { %v72_v5 = vsel %vm71_vm0, %v61_v2, 0.0  ;;  %85 = vadd.xlane.f32.xlu2 %v84_v3  ;;  %79 = vadd.xlane.f32.xlu1 %v78_v4  ;;  %v62_v8 = vld [vmem:[%s2942_s0 + $0x8] sm:$0xff]  ;;  %v87_v9 = vsel %vm71_vm0, %v66_v6, 0.0  ;;  %v81_v10 = vsel %vm71_vm0, %v64_v7, 0.0  ;;  %v67_v12 = vld [vmem:[%s2942_s0 + $0x30] sm:$0xff]  ;;  %v68_v36 = vld [vmem:[%s2942_s0 + $0x38] sm:$0xff] }
   0xe   :  { %73 = vadd.xlane.f32.xlu0 %v72_v5  ;;  %v75_v11 = vsel %vm71_vm0, %v62_v8, 0.0  ;;  %v90_v13 = vsel %vm71_vm0, %v67_v12, 0.0  ;;  %v93_v41 = vsel %vm71_vm0, %v68_v36, 0.0  ;;  %v1416_v60 = vld [vmem:[%s2945_s3] sm:$0xf] }
   0xf   :  { %v1482_v61 = vld [vmem:[%s2945_s3 + $0x1c] sm:$0xf0]  ;;  %v1478_v62 = vld [vmem:[%s2945_s3 + $0x4] sm:$0xf]  ;;  %v1483_v4 = vld [vmem:[%s2945_s3 + $0x24] sm:$0xf0] }
  0x10   :  { %v1479_v5 = vld [vmem:[%s2945_s3 + $0xc] sm:$0xf] }
  0x12   :  { %v1496_v15 = vpop.eup %1495 }
  0x13   :  { %v97_v16 = vmul.f32 16.0, %v1496_v15  ;;  %vm101_vm1 = vweird.f32 %v1496_v15 }
  0x15   :  { %88 = vadd.xlane.f32.xlu2 %v87_v9  ;;  %82 = vadd.xlane.f32.xlu1 %v81_v10  ;;  %v98_v17 = vsub.f32 1.0, %v97_v16 }
  0x16   :  { %76 = vadd.xlane.f32.xlu0 %v75_v11 }
  0x17   :  { %v99_v18 = vmul.f32 %v1496_v15, %v98_v17 }
  0x19   :  { %v100_v19 = vadd.f32 %v1496_v15, %v99_v18 }
  0x1b   :  { %v1698_v20 = vsel %vm101_vm1, %v1496_v15, %v100_v19 }
  0x1d   :  { %91 = vadd.xlane.f32.xlu2 %v90_v13 }
  0x80   :  { %v86_v21 = vpop.xlane.xlu2 %85  ;;  %v80_v22 = vpop.xlane.xlu1 %79 }
  0x81   :  { %v74_v23 = vpop.xlane.xlu0 %73  ;;  %v107_v32 = vmul.f32 %v1698_v20, %v86_v21  ;;  %v105_v33 = vmul.f32 %v1698_v20, %v80_v22 }
  0x82   :  { %v103_v24 = vmul.f32 %v1698_v20, %v74_v23 }
  0x83   :  { %v1719_v39 = vsub.f32 %v65_v0, %v107_v32  ;;  %v1721_v40 = vsub.f32 %v63_v1, %v105_v33  ;;  %v1417_v0 = vor.u32 %v1482_v61, %v1416_v60  ;;  %v1418_v1 = vld [vmem:[%s2945_s3 + $0x20] sm:$0xf0]  ;;  %v1805_v60 = vld [vmem:[%s2944_s2] ss:$0 sm:$0xff] }
  0x84   :  { %v1701_v25 = vsub.f32 %v61_v2, %v103_v24  ;;  %v1424_v2 = vld [vmem:[%s2945_s3 + $0x8] sm:$0xf]  ;;  %v1421_v3 = vor.u32 %v1478_v62, %v1418_v1 }
  0x85   :  { %v123_v48 = vmul.f32 %v1719_v39, %v1719_v39  ;;  %v121_v49 = vmul.f32 %v1721_v40, %v1721_v40  ;;  %366 = vmatpush.bf16.msra.mxu0 %v1417_v0 }
  0x86   :  { %v119_v26 = vmul.f32 %v1701_v25, %v1701_v25  ;;  %395 = vmatpush.bf16.msra.mxu1 %v1421_v3 }
  0x87   :  { %v139_v53 = vsel %vm71_vm0, %v123_v48, 0.0  ;;  %v133_v54 = vsel %vm71_vm0, %v121_v49, 0.0 }
  0x88   :  { %v89_v27 = vpop.xlane.xlu2 %88  ;;  %v83_v28 = vpop.xlane.xlu1 %82  ;;  %v127_v29 = vsel %vm71_vm0, %v119_v26, 0.0 }
  0x89   :  { %v106_v30 = vmul.f32 %v1698_v20, %v83_v28  ;;  %128 = vadd.xlane.f32.xlu0 %v127_v29  ;;  %v77_v31 = vpop.xlane.xlu0 %76  ;;  %v108_v47 = vmul.f32 %v1698_v20, %v89_v27 }
  0x8a   :  { %v104_v34 = vmul.f32 %v1698_v20, %v77_v31 }
  0x8b   :  { %v1710_v35 = vsub.f32 %v64_v7, %v106_v30  ;;  %v1738_v52 = vsub.f32 %v66_v6, %v108_v47  ;;  %v1426_v6 = vld [vmem:[%s2945_s3 + $0x28] sm:$0xf0]  ;;  %v1425_v7 = vor.u32 %v1483_v4, %v1424_v2 }
  0x8c   :  { %v1715_v37 = vsub.f32 %v62_v8, %v104_v34  ;;  %v1429_v8 = vor.u32 %v1479_v5, %v1426_v6 }
  0x8d   :  { %v122_v38 = vmul.f32 %v1710_v35, %v1710_v35  ;;  %v124_v56 = vmul.f32 %v1738_v52, %v1738_v52  ;;  %424 = vmatpush.bf16.msra.mxu2 %v1425_v7 }
  0x8e   :  { %v120_v42 = vmul.f32 %v1715_v37, %v1715_v37  ;;  %453 = vmatpush.bf16.msra.mxu3 %v1429_v8 }
  0x8f   :  { %v136_v43 = vsel %vm71_vm0, %v122_v38, 0.0  ;;  %v142_v57 = vsel %vm71_vm0, %v124_v56, 0.0 }
  0x90   :  { %v92_v44 = vpop.xlane.xlu2 %91  ;;  %137 = vadd.xlane.f32.xlu2 %v136_v43  ;;  %v130_v45 = vsel %vm71_vm0, %v120_v42, 0.0 }
  0x91   :  { %v109_v46 = vmul.f32 %v1698_v20, %v92_v44  ;;  %94 = vadd.xlane.f32.xlu0 %v93_v41  ;;  %131 = vadd.xlane.f32.xlu1 %v130_v45 }
  0x93   :  { %v1734_v50 = vsub.f32 %v67_v12, %v109_v46 }
  0x95   :  { %v125_v51 = vmul.f32 %v1734_v50, %v1734_v50 }
  0x97   :  { %v145_v55 = vsel %vm71_vm0, %v125_v51, 0.0  ;;  %v1795_v51 = vld [vmem:[%s2943_s1] ss:$0 sm:$0xff] }
  0x98   :  { %146 = vadd.xlane.f32.xlu2 %v145_v55 }
  0x99   :  { %140 = vadd.xlane.f32.xlu0 %v139_v53  ;;  %134 = vadd.xlane.f32.xlu1 %v133_v54 }
  0xa1   :  { %143 = vadd.xlane.f32.xlu1 %v142_v57 }
  0xfc   :  { %v129_v58 = vpop.xlane.xlu0 %128 }
  0xfd   :  { %v151_v59 = vmul.f32 %v129_v58, %v1698_v20 }
  0xff   :  { %v159_v63 = vadd.f32 1e-05, %v151_v59 }
 0x101   :  { %1497 = vrsqrt.f32 %v159_v63  ;;  %vm173_vm3 = vweird.f32 %v159_v63 }
 0x103   :  { %v138_v9 = vpop.xlane.xlu2 %137 }
 0x104   :  { %v154_v10 = vmul.f32 %v138_v9, %v1698_v20  ;;  %v132_v11 = vpop.xlane.xlu1 %131  ;;  %v95_v12 = vpop.xlane.xlu0 %94 }
 0x105   :  { %v152_v13 = vmul.f32 %v132_v11, %v1698_v20  ;;  %v110_v14 = vmul.f32 %v1698_v20, %v95_v12 }
 0x106   :  { %v1774_v15 = vadd.f32 1e-05, %v154_v10 }
 0x107   :  { %v1498_v16 = vpop.eup %1497  ;;  %v160_v17 = vadd.f32 1e-05, %v152_v13  ;;  %v1776_v18 = vsub.f32 %v68_v36, %v110_v14 }
 0x108   :  { %v168_v19 = vmul.f32 %v1498_v16, %v159_v63  ;;  %1499 = vrsqrt.f32 %v1774_v15  ;;  %vm174_vm2 = vweird.f32 %v1498_v16  ;;  %vm203_vm10 = vweird.f32 %v1774_v15 }
 0x109   :  { %1501 = vrsqrt.f32 %v160_v17  ;;  %v126_v21 = vmul.f32 %v1776_v18, %v1776_v18  ;;  %vm175_vm4 = vmor %vm173_vm3, %vm174_vm2  ;;  %vm183_vm5 = vweird.f32 %v160_v17 }
 0x10a   :  { %v169_v22 = vmul.f32 %v1498_v16, %v168_v19  ;;  %v1432_v19 = vld [vmem:[%s2945_s3 + $0x10] sm:$0xf] }
 0x10b   :  { %v148_v23 = vsel %vm71_vm0, %v126_v21, 0.0 }
 0x10c   :  { %v170_v24 = vmul.f32 0.5, %v169_v22  ;;  %v135_v26 = vpop.xlane.xlu1 %134  ;;  %149 = vadd.xlane.f32.xlu0 %v148_v23  ;;  %v141_v27 = vpop.xlane.xlu0 %140 }
 0x10d   :  { %v153_v28 = vmul.f32 %v135_v26, %v1698_v20  ;;  %v155_v33 = vmul.f32 %v141_v27, %v1698_v20  ;;  %v1481_v26 = vld [vmem:[%s2945_s3 + $0x1c] sm:$0xf] }
 0x10e   :  { %v1783_v29 = vpop.eup %1499  ;;  %v171_v30 = vsub.f32 1.5, %v170_v24  ;;  %v1484_v24 = vld [vmem:[%s2945_s3 + $0x2c] sm:$0xf0] }
 0x10f   :  { %v1502_v31 = vpop.eup %1501  ;;  %v161_v32 = vadd.f32 1e-05, %v153_v28  ;;  %v198_v36 = vmul.f32 %v1783_v29, %v1774_v15  ;;  %v1788_v42 = vadd.f32 1e-05, %v155_v33  ;;  %vm204_vm11 = vweird.f32 %v1783_v29  ;;  %v1442_v28 = vld [vmem:[%s2945_s3 + $0x38] sm:$0xf0] }
 0x110   :  { %v172_v34 = vmul.f32 %v1498_v16, %v171_v30  ;;  %v178_v38 = vmul.f32 %v1502_v31, %v160_v17  ;;  %vm184_vm6 = vweird.f32 %v1502_v31  ;;  %vm1823_vm13 = vmor %vm203_vm10, %vm204_vm11  ;;  %v1485_v17 = vld [vmem:[%s2945_s3 + $0x34] sm:$0xf0]  ;;  %v1433_v27 = vor.u32 %v1484_v24, %v1432_v19 }
 0x111   :  { %1503 = vrsqrt.f32 %v161_v32  ;;  %v199_v44 = vmul.f32 %v1783_v29, %v198_v36  ;;  %vm185_vm7 = vmor %vm183_vm5, %vm184_vm6  ;;  %vm193_vm8 = vweird.f32 %v161_v32  ;;  %vm213_vm1 = vweird.f32 %v1788_v42 }
 0x112   :  { %v179_v41 = vmul.f32 %v1502_v31, %v178_v38  ;;  %v176_v43 = vsel %vm175_vm4, %v1498_v16, %v172_v34  ;;  %1505 = vrsqrt.f32 %v1788_v42  ;;  %v1440_v16 = vld [vmem:[%s2945_s3 + $0x18] sm:$0xf]  ;;  %482 = vmatpush.bf16.msrb.mxu0 %v1433_v27 }
 0x113   :  { %v247_v53 = vmul.f32 %v176_v43, %v1701_v25  ;;  %v200_v54 = vmul.f32 0.5, %v199_v44  ;;  %v1441_v23 = vor.u32 %v1485_v17, %v1440_v16 }
 0x114   :  { %v180_v45 = vmul.f32 0.5, %v179_v41  ;;  %v144_v46 = vpop.xlane.xlu1 %143 }
 0x115   :  { %v156_v47 = vmul.f32 %v144_v46, %v1698_v20  ;;  %v258_v61 = vmul.f32 %v1795_v51, %v247_v53  ;;  %v201_v62 = vsub.f32 1.5, %v200_v54  ;;  %540 = vmatpush.bf16.msrb.mxu2 %v1441_v23 }
 0x116   :  { %v181_v48 = vsub.f32 1.5, %v180_v45 }
 0x117   :  { %v1504_v49 = vpop.eup %1503  ;;  %v1799_v57 = vadd.f32 1e-05, %v156_v47  ;;  %v269_v3 = vadd.f32 %v1805_v60, %v258_v61  ;;  %v202_v6 = vmul.f32 %v1783_v29, %v201_v62 }
 0x118   :  { %v182_v55 = vmul.f32 %v1502_v31, %v181_v48  ;;  %v188_v56 = vmul.f32 %v1504_v49, %v161_v32  ;;  %vm194_vm9 = vweird.f32 %v1504_v49  ;;  %v1809_v0 = vpop.eup %1505 }
 0x119   :  { %1507 = vrsqrt.f32 %v1799_v57  ;;  %vm1816_vm12 = vmor %vm193_vm8, %vm194_vm9  ;;  %v208_v8 = vmul.f32 %v1809_v0, %v1788_v42  ;;  %v206_v14 = vsel %vm1823_vm13, %v1783_v29, %v202_v6  ;;  %v1480_v29 = vld [vmem:[%s2945_s3 + $0x14] sm:$0xf]  ;;  %vm223_vm14 = vweird.f32 %v1799_v57 }
 0x11a   :  { %v186_v58 = vsel %vm185_vm7, %v1502_v31, %v182_v55  ;;  %v189_v59 = vmul.f32 %v1504_v49, %v188_v56  ;;  %v250_v30 = vmul.f32 %v206_v14, %v1710_v35  ;;  %v1445_v31 = vor.u32 %v1481_v26, %v1442_v28 }
 0x11b   :  { %v248_v25 = vmul.f32 %v186_v58, %v1715_v37  ;;  %v209_v15 = vmul.f32 %v1809_v0, %v208_v8  ;;  %vm214_vm2 = vweird.f32 %v1809_v0 }
 0x11c   :  { %v190_v63 = vmul.f32 0.5, %v189_v59  ;;  %569 = vmatpush.bf16.msrb.mxu3 %v1445_v31  ;;  %v261_v38 = vmul.f32 %v1795_v51, %v250_v30  ;;  %vm215_vm4 = vmor %vm213_vm1, %vm214_vm2 }
 0x11d   :  { %v259_v1 = vmul.f32 %v1795_v51, %v248_v25  ;;  %v210_v33 = vmul.f32 0.5, %v209_v15 }
 0x11e   :  { %v191_v2 = vsub.f32 1.5, %v190_v63  ;;  %v272_v44 = vadd.f32 %v1805_v60, %v261_v38 }
 0x11f   :  { %v270_v4 = vadd.f32 %v1805_v60, %v259_v1  ;;  %v1508_v37 = vpop.eup %1507  ;;  %v211_v41 = vsub.f32 1.5, %v210_v33 }
 0x120   :  { %v192_v7 = vmul.f32 %v1504_v49, %v191_v2  ;;  %v218_v11 = vmul.f32 %v1508_v37, %v1799_v57  ;;  %vm224_vm15 = vweird.f32 %v1508_v37 }
 0x121   :  { %v1827_v10 = vpack.c.bf16 %v270_v4, %v269_v3  ;;  %vm225_vm3 = vmor %vm223_vm14, %vm224_vm15  ;;  %v212_v45 = vmul.f32 %v1809_v0, %v211_v41 }
 0x122   :  { %v196_v12 = vsel %vm1816_vm12, %v1504_v49, %v192_v7  ;;  %v219_v13 = vmul.f32 %v1508_v37, %v218_v11 }
 0x123   :  { %1446 = vmatmul.msk.bf16.vlgmr.msra.gmra.mxu0 %vm71_vm0, %v1827_v10  ;;  %1450 = vmatmul.msk.bf16.vlgmr.msra.gmra.mxu1 %vm71_vm0, %v1827_v10  ;;  %v249_v21 = vmul.f32 %v196_v12, %v1721_v40  ;;  %v1434_v40 = vld [vmem:[%s2945_s3 + $0x30] sm:$0xf0]  ;;  %v216_v42 = vsel %vm215_vm4, %v1809_v0, %v212_v45  ;;  %v289_v45 = vld [vmem:[%s2946_s4] sm:$0xff] }
 0x124   :  { %1454 = vmatmul.msk.bf16.vlgmr.msra.gmra.mxu2 %vm71_vm0, %v1827_v10  ;;  %1458 = vmatmul.msk.bf16.vlgmr.msra.gmra.mxu3 %vm71_vm0, %v1827_v10  ;;  %v220_v22 = vmul.f32 0.5, %v219_v13  ;;  %v1437_v32 = vor.u32 %v1480_v29, %v1434_v40  ;;  %v251_v49 = vmul.f32 %v216_v42, %v1719_v39  ;;  %v1972_v42 = vperm.slane %v289_v45, 2 }
 0x125   :  { %v260_v34 = vmul.f32 %v1795_v51, %v249_v21 }
 0x126   :  { %511 = vmatpush.bf16.msrb.mxu1 %v1437_v32  ;;  %v221_v36 = vsub.f32 1.5, %v220_v22  ;;  %v262_v54 = vmul.f32 %v1795_v51, %v251_v49 }
 0x127   :  { %v271_v43 = vadd.f32 %v1805_v60, %v260_v34 }
 0x128   :  { %v222_v35 = vmul.f32 %v1508_v37, %v221_v36  ;;  %v273_v56 = vadd.f32 %v1805_v60, %v262_v54 }
 0x129   :  { %v1878_v46 = vpack.c.bf16 %v272_v44, %v271_v43 }
 0x12a   :  { %v226_v47 = vsel %vm225_vm3, %v1508_v37, %v222_v35 }
 0x12b   :  { %v252_v48 = vmul.f32 %v226_v47, %v1738_v52  ;;  %v147_v52 = vpop.xlane.xlu2 %146  ;;  %v1970_v47 = vperm.slane %v289_v45, 1 }
 0x12c   :  { %v157_v39 = vmul.f32 %v147_v52, %v1698_v20 }
 0x12d   :  { %v263_v53 = vmul.f32 %v1795_v51, %v252_v48 }
 0x12e   :  { %v165_v58 = vadd.f32 1e-05, %v157_v39  ;;  %v1993_v39 = vperm.slane %v289_v45, 3 }
 0x12f   :  { %v274_v55 = vadd.f32 %v1805_v60, %v263_v53 }
 0x130   :  { %1509 = vrsqrt.f32 %v165_v58  ;;  %vm233_vm5 = vweird.f32 %v165_v58 }
 0x131   :  { %v279_v57 = vpack.c.bf16 %v274_v55, %v273_v56 }
 0x133   :  { %1447 = vmatmul.msk.bf16.gmra.mxu0 %vm71_vm0, %v1878_v46  ;;  %1451 = vmatmul.msk.bf16.gmra.mxu1 %vm71_vm0, %v1878_v46 }
 0x134   :  { %1455 = vmatmul.msk.bf16.gmra.mxu2 %vm71_vm0, %v1878_v46  ;;  %1459 = vmatmul.msk.bf16.gmra.mxu3 %vm71_vm0, %v1878_v46 }
 0x136   :  { %v1510_v59 = vpop.eup %1509 }
 0x137   :  { %v228_v61 = vmul.f32 %v1510_v59, %v165_v58  ;;  %vm234_vm6 = vweird.f32 %v1510_v59  ;;  %v1995_v58 = vperm.slane %v289_v45, 4 }
 0x138   :  { %vm235_vm7 = vmor %vm233_vm5, %vm234_vm6 }
 0x139   :  { %v229_v25 = vmul.f32 %v1510_v59, %v228_v61 }
 0x13b   :  { %v230_v1 = vmul.f32 0.5, %v229_v25 }
 0x13d   :  { %v231_v2 = vsub.f32 1.5, %v230_v1 }
 0x13f   :  { %v232_v4 = vmul.f32 %v1510_v59, %v231_v2 }
 0x141   :  { %v236_v6 = vsel %vm235_vm7, %v1510_v59, %v232_v4 }
 0x142   :  { %v253_v9 = vmul.f32 %v236_v6, %v1734_v50 }
 0x143   :  { %1448 = vmatmul.msk.bf16.gmra.mxu0 %vm71_vm0, %v279_v57  ;;  %1452 = vmatmul.msk.bf16.gmra.mxu1 %vm71_vm0, %v279_v57 }
 0x144   :  { %1456 = vmatmul.msk.bf16.gmra.mxu2 %vm71_vm0, %v279_v57  ;;  %1460 = vmatmul.msk.bf16.gmra.mxu3 %vm71_vm0, %v279_v57  ;;  %v264_v12 = vmul.f32 %v1795_v51, %v253_v9 }
 0x146   :  { %v275_v15 = vadd.f32 %v1805_v60, %v264_v12 }
 0x17f   :  { %v150_v62 = vpop.xlane.xlu0 %149 }
 0x180   :  { %v158_v63 = vmul.f32 %v150_v62, %v1698_v20 }
 0x182   :  { %v166_v0 = vadd.f32 1e-05, %v158_v63 }
 0x184   :  { %1511 = vrsqrt.f32 %v166_v0  ;;  %vm243_vm9 = vweird.f32 %v166_v0 }
 0x18a   :  { %v1512_v3 = vpop.eup %1511 }
 0x18b   :  { %v238_v5 = vmul.f32 %v1512_v3, %v166_v0  ;;  %vm244_vm8 = vweird.f32 %v1512_v3 }
 0x18c   :  { %vm245_vm10 = vmor %vm243_vm9, %vm244_vm8 }
 0x18d   :  { %v239_v37 = vmul.f32 %v1512_v3, %v238_v5 }
 0x18f   :  { %v240_v7 = vmul.f32 0.5, %v239_v37  ;;  %v2018_v37 = vperm.slane %v289_v45, 5 }
 0x191   :  { %v241_v8 = vsub.f32 1.5, %v240_v7 }
 0x193   :  { %v242_v11 = vmul.f32 %v1512_v3, %v241_v8  ;;  %v2023_v8 = vperm.slane %v289_v45, 6 }
 0x195   :  { %v246_v20 = vsel %vm245_vm10, %v1512_v3, %v242_v11 }
 0x196   :  { %v254_v13 = vmul.f32 %v246_v20, %v1776_v18  ;;  %v2029_v20 = vperm.slane %v289_v45, 7 }
 0x198   :  { %v265_v14 = vmul.f32 %v1795_v51, %v254_v13 }
 0x19a   :  { %v276_v16 = vadd.f32 %v1805_v60, %v265_v14 }
 0x19c   :  { %v280_v17 = vpack.c.bf16 %v276_v16, %v275_v15 }
 0x19e   :  { %1449 = vmatmul.msk.bf16.gmra.mxu0 %vm71_vm0, %v280_v17  ;;  %1453 = vmatmul.msk.bf16.gmra.mxu1 %vm71_vm0, %v280_v17 }
 0x19f   :  { %1457 = vmatmul.msk.bf16.gmra.mxu2 %vm71_vm0, %v280_v17  ;;  %1461 = vmatmul.msk.bf16.gmra.mxu3 %vm71_vm0, %v280_v17 }
 0x1a0   :  { %v368_v50 = vpop.f32.mrf.mxu0  ;;  %v397_v18 = vpop.f32.mrf.mxu1 }
 0x1a1   :  { %v1982_v54 = vadd.f32 %v397_v18, %v1970_v47 }
 0x1a7   :  { %v426_v51 = vpop.f32.mrf.mxu2  ;;  %v455_v60 = vpop.f32.mrf.mxu3 }
 0x1a8   :  { %v399_v19 = vpop.f32.mrf.mxu1  ;;  %v2003_v62 = vadd.f32 %v455_v60, %v1993_v39 }
 0x1a9   :  { %v2009_v0 = vadd.f32 %v399_v19, %v1970_v47 }
 0x1ae   :  { %1462 = vmatmul.msk.bf16.vlgmr.msrb.gmra.mxu0 %vm71_vm0, %v1827_v10  ;;  %1466 = vmatmul.msk.bf16.vlgmr.msrb.gmra.mxu1 %vm71_vm0, %v1827_v10 }
 0x1af   :  { %1470 = vmatmul.msk.bf16.vlgmr.msrb.gmra.mxu2 %vm71_vm0, %v1827_v10  ;;  %1474 = vmatmul.msk.bf16.vlgmr.msrb.gmra.mxu3 %vm71_vm0, %v1827_v10  ;;  %v370_v10 = vpop.f32.mrf.mxu0  ;;  %v428_v21 = vpop.f32.mrf.mxu2 }
 0x1b0   :  { %v457_v22 = vpop.f32.mrf.mxu3  ;;  %v402_v24 = vpop.f32.mrf.mxu1  ;;  %v2016_v5 = vadd.f32 %v428_v21, %v1972_v42 }
 0x1b1   :  { %v2032_v12 = vadd.f32 %v457_v22, %v1993_v39  ;;  %v2038_v16 = vadd.f32 %v402_v24, %v1970_v47 }
 0x1b7   :  { %v373_v23 = vpop.f32.mrf.mxu0  ;;  %v431_v26 = vpop.f32.mrf.mxu2 }
 0x1b8   :  { %v1935_v27 = vpop.f32.mrf.mxu3  ;;  %v1939_v29 = vpop.f32.mrf.mxu1  ;;  %v2049_v19 = vadd.f32 %v431_v26, %v1972_v42 }
 0x1b9   :  { %v2065_v26 = vadd.f32 %v1935_v27, %v1993_v39 }
 0x1be   :  { %1463 = vmatmul.msk.bf16.gmra.mxu0 %vm71_vm0, %v1878_v46  ;;  %1467 = vmatmul.msk.bf16.gmra.mxu1 %vm71_vm0, %v1878_v46 }
 0x1bf   :  { %1471 = vmatmul.msk.bf16.gmra.mxu2 %vm71_vm0, %v1878_v46  ;;  %1475 = vmatmul.msk.bf16.gmra.mxu3 %vm71_vm0, %v1878_v46  ;;  %v1937_v28 = vpop.f32.mrf.mxu0  ;;  %v1941_v40 = vpop.f32.mrf.mxu2  ;;  %v1968_v46 = vperm.slane %v289_v45, 0 }
 0x1c0   :  { %v1943_v30 = vpop.f32.mrf.mxu3  ;;  %v1947_v32 = vpop.f32.mrf.mxu1 }
 0x1c1   :  { %v1979_v53 = vadd.f32 %v368_v50, %v1968_v46  ;;  %v2006_v63 = vadd.f32 %v370_v10, %v1968_v46  ;;  %v2035_v15 = vadd.f32 %v373_v23, %v1968_v46 }
 0x1c3   :  { %v593_v52 = vadd.f32 %v1982_v54, %v1979_v53  ;;  %v602_v6 = vadd.f32 %v2009_v0, %v2006_v63  ;;  %v611_v23 = vadd.f32 %v2038_v16, %v2035_v15 }
 0x1c5   :  { %v603_v9 = vadd.f32 %v602_v6, %v2016_v5  ;;  %v2073_v6 = vadd.f32 %v1939_v29, %v1970_v47 }
 0x1c7   :  { %v1945_v31 = vpop.f32.mrf.mxu0  ;;  %v1949_v33 = vpop.f32.mrf.mxu2  ;;  %v604_v10 = vadd.f32 %v603_v9, %v2032_v12 }
 0x1c8   :  { %v1951_v34 = vpop.f32.mrf.mxu3  ;;  %v1955_v38 = vpop.f32.mrf.mxu1 }
 0x1ce   :  { %1464 = vmatmul.msk.bf16.gmra.mxu0 %vm71_vm0, %v279_v57  ;;  %1468 = vmatmul.msk.bf16.gmra.mxu1 %vm71_vm0, %v279_v57 }
 0x1cf   :  { %1472 = vmatmul.msk.bf16.gmra.mxu2 %vm71_vm0, %v279_v57  ;;  %1476 = vmatmul.msk.bf16.gmra.mxu3 %vm71_vm0, %v279_v57  ;;  %v1953_v36 = vpop.f32.mrf.mxu0  ;;  %v1957_v41 = vpop.f32.mrf.mxu2  ;;  %v1989_v57 = vadd.f32 %v426_v51, %v1972_v42 }
 0x1d0   :  { %v1959_v43 = vpop.f32.mrf.mxu3 }
 0x1d1   :  { %v594_v59 = vadd.f32 %v593_v52, %v1989_v57  ;;  %v612_v52 = vadd.f32 %v611_v23, %v2049_v19 }
 0x1d3   :  { %v595_v4 = vadd.f32 %v594_v59, %v2003_v62 }
 0x1de   :  { %1465 = vmatmul.msk.bf16.gmra.mxu0 %vm71_vm0, %v280_v17  ;;  %1469 = vmatmul.msk.bf16.gmra.mxu1 %vm71_vm0, %v280_v17 }
 0x1df   :  { %1473 = vmatmul.msk.bf16.gmra.mxu2 %vm71_vm0, %v280_v17  ;;  %1477 = vmatmul.msk.bf16.gmra.mxu3 %vm71_vm0, %v280_v17 }
 0x21b   :  { %v1961_v35 = vpop.f32.mrf.mxu0  ;;  %v1963_v44 = vpop.f32.mrf.mxu1 }
 0x222   :  { %v1974_v48 = vpop.f32.mrf.mxu2  ;;  %v1976_v49 = vpop.f32.mrf.mxu3 }
 0x223   :  { %v1984_v55 = vpop.f32.mrf.mxu0  ;;  %v1986_v56 = vpop.f32.mrf.mxu1 }
 0x22a   :  { %v1998_v61 = vpop.f32.mrf.mxu2  ;;  %v2000_v25 = vpop.f32.mrf.mxu3 }
 0x22b   :  { %v484_v1 = vpop.f32.mrf.mxu0  ;;  %v513_v2 = vpop.f32.mrf.mxu1 }
 0x22c   :  { %v2012_v3 = vadd.f32 %v484_v1, %v1995_v58  ;;  %v2027_v11 = vadd.f32 %v513_v2, %v2018_v37 }
 0x22e   :  { %v596_v7 = vadd.f32 %v595_v4, %v2012_v3  ;;  %v2069_v4 = vadd.f32 %v1937_v28, %v1968_v46  ;;  %v2085_v28 = vadd.f32 %v1941_v40, %v1972_v42  ;;  %v2101_v40 = vadd.f32 %v1943_v30, %v1993_v39 }
 0x230   :  { %v597_v17 = vadd.f32 %v596_v7, %v2027_v11  ;;  %3013 = vst [vmem:[#allocation11_spill] sm:$0xff] %v2101_v40 }
 0x232   :  { %v542_v13 = vpop.f32.mrf.mxu2  ;;  %v571_v14 = vpop.f32.mrf.mxu3 }
 0x233   :  { %v2042_v50 = vadd.f32 %v542_v13, %v2023_v8  ;;  %v486_v18 = vpop.f32.mrf.mxu0  ;;  %v515_v51 = vpop.f32.mrf.mxu1  ;;  %v2053_v22 = vadd.f32 %v571_v14, %v2029_v20 }
 0x234   :  { %v2045_v60 = vadd.f32 %v486_v18, %v1995_v58  ;;  %v2061_v59 = vadd.f32 %v515_v51, %v2018_v37  ;;  %v620_v51 = vadd.f32 %v2073_v6, %v2069_v4 }
 0x235   :  { %v598_v21 = vadd.f32 %v597_v17, %v2042_v50  ;;  %v613_v17 = vadd.f32 %v612_v52, %v2065_v26 }
 0x236   :  { %v605_v24 = vadd.f32 %v604_v10, %v2045_v60  ;;  %v621_v23 = vadd.f32 %v620_v51, %v2085_v28 }
 0x237   :  { %v599_v45 = vadd.f32 %v598_v21, %v2053_v22 }
 0x238   :  { %v606_v7 = vadd.f32 %v605_v24, %v2061_v59 }
 0x239   :  { %600 = vadd.xlane.f32.xlu1 %v599_v45 }
 0x23a   :  { %v544_v1 = vpop.f32.mrf.mxu2  ;;  %v573_v2 = vpop.f32.mrf.mxu3 }
 0x23b   :  { %v2077_v9 = vadd.f32 %v544_v1, %v2023_v8  ;;  %v489_v13 = vpop.f32.mrf.mxu0  ;;  %v518_v14 = vpop.f32.mrf.mxu1  ;;  %v2089_v29 = vadd.f32 %v573_v2, %v2029_v20  ;;  %v2105_v1 = vadd.f32 %v1945_v31, %v1968_v46  ;;  %v2109_v2 = vadd.f32 %v1947_v32, %v1970_v47 }
 0x23c   :  { %v2080_v27 = vadd.f32 %v489_v13, %v1995_v58  ;;  %v2097_v24 = vadd.f32 %v518_v14, %v2018_v37  ;;  %v2121_v31 = vadd.f32 %v1949_v33, %v1972_v42  ;;  %v2137_v33 = vadd.f32 %v1951_v34, %v1993_v39 }
 0x23d   :  { %v607_v18 = vadd.f32 %v606_v7, %v2077_v9  ;;  %3014 = vst [vmem:[#allocation12_spill] sm:$0xff] %v2105_v1 }
 0x23e   :  { %v614_v10 = vadd.f32 %v613_v17, %v2080_v27  ;;  %3015 = vst [vmem:[#allocation13_spill] sm:$0xff] %v2109_v2 }
 0x23f   :  { %v608_v21 = vadd.f32 %v607_v18, %v2089_v29  ;;  %v622_v18 = vadd.f32 %v621_v23, %v2101_v40  ;;  %3016 = vst [vmem:[#allocation14_spill] sm:$0xff] %v2121_v31  ;;  %v2141_v40 = vadd.f32 %v1953_v36, %v1968_v46  ;;  %v2157_v36 = vadd.f32 %v1957_v41, %v1972_v42 }
 0x240   :  { %v615_v7 = vadd.f32 %v614_v10, %v2097_v24  ;;  %v629_v10 = vadd.f32 %v2109_v2, %v2105_v1  ;;  %3017 = vst [vmem:[#allocation15_spill] sm:$0xff] %v2137_v33  ;;  %v2173_v41 = vadd.f32 %v1959_v43, %v1993_v39 }
 0x241   :  { %609 = vadd.xlane.f32.xlu2 %v608_v21  ;;  %3018 = vst [vmem:[#allocation16_spill] sm:$0xff] %v2141_v40 }
 0x242   :  { %v547_v45 = vpop.f32.mrf.mxu2  ;;  %v576_v52 = vpop.f32.mrf.mxu3  ;;  %3020 = vst [vmem:[#allocation18_spill] sm:$0xff] %v2157_v36 }
 0x243   :  { %v2113_v13 = vadd.f32 %v547_v45, %v2023_v8  ;;  %v491_v14 = vpop.f32.mrf.mxu0  ;;  %v520_v17 = vpop.f32.mrf.mxu1  ;;  %v2125_v32 = vadd.f32 %v576_v52, %v2029_v20  ;;  %3021 = vst [vmem:[#allocation19_spill] sm:$0xff] %v2173_v41 }
 0x244   :  { %v2116_v30 = vadd.f32 %v491_v14, %v1995_v58  ;;  %v630_v14 = vadd.f32 %v629_v10, %v2121_v31  ;;  %v2133_v23 = vadd.f32 %v520_v17, %v2018_v37 }
 0x245   :  { %v616_v51 = vadd.f32 %v615_v7, %v2113_v13 }
 0x246   :  { %v623_v21 = vadd.f32 %v622_v18, %v2116_v30  ;;  %v2145_v18 = vadd.f32 %v1955_v38, %v1970_v47  ;;  %v631_v31 = vadd.f32 %v630_v14, %v2137_v33  ;;  %v2177_v33 = vadd.f32 %v1961_v35, %v1968_v46 }
 0x247   :  { %v617_v45 = vadd.f32 %v616_v51, %v2125_v32  ;;  %v2193_v35 = vadd.f32 %v1974_v48, %v1972_v42  ;;  %v2209_v48 = vadd.f32 %v1976_v49, %v1993_v39 }
 0x248   :  { %3019 = vst [vmem:[#allocation17_spill] sm:$0xff] %v2145_v18  ;;  %v624_v51 = vadd.f32 %v623_v21, %v2133_v23  ;;  %v638_v21 = vadd.f32 %v2145_v18, %v2141_v40 }
 0x249   :  { %618 = vadd.xlane.f32.xlu0 %v617_v45  ;;  %3022 = vst [vmem:[#allocation20_spill] sm:$0xff] %v2193_v35 }
 0x24a   :  { %v549_v7 = vpop.f32.mrf.mxu2  ;;  %v578_v52 = vpop.f32.mrf.mxu3 }
 0x24b   :  { %v2149_v17 = vadd.f32 %v549_v7, %v2023_v8  ;;  %v494_v10 = vpop.f32.mrf.mxu0  ;;  %v523_v45 = vpop.f32.mrf.mxu1  ;;  %v2161_v38 = vadd.f32 %v578_v52, %v2029_v20 }
 0x24c   :  { %v2152_v34 = vadd.f32 %v494_v10, %v1995_v58  ;;  %v639_v10 = vadd.f32 %v638_v21, %v2157_v36  ;;  %v2169_v14 = vadd.f32 %v523_v45, %v2018_v37 }
 0x24d   :  { %v625_v2 = vadd.f32 %v624_v51, %v2149_v17 }
 0x24e   :  { %v632_v7 = vadd.f32 %v631_v31, %v2152_v34  ;;  %v2181_v31 = vadd.f32 %v1963_v44, %v1970_v47  ;;  %v640_v36 = vadd.f32 %v639_v10, %v2173_v41  ;;  %v2213_v41 = vadd.f32 %v1984_v55, %v1968_v46 }
 0x24f   :  { %v626_v1 = vadd.f32 %v625_v2, %v2161_v38  ;;  %v2229_v46 = vadd.f32 %v1998_v61, %v1972_v42 }
 0x250   :  { %v633_v2 = vadd.f32 %v632_v7, %v2169_v14  ;;  %v647_v7 = vadd.f32 %v2181_v31, %v2177_v33  ;;  %3023 = vst [vmem:[#allocation21_spill] sm:$0xff] %v2213_v41 }
 0x251   :  { %627 = vadd.xlane.f32.xlu1 %v626_v1  ;;  %3025 = vst [vmem:[#allocation23_spill] sm:$0xff] %v2229_v46 }
 0x252   :  { %v552_v51 = vpop.f32.mrf.mxu2  ;;  %v581_v52 = vpop.f32.mrf.mxu3 }
 0x253   :  { %v2185_v45 = vadd.f32 %v552_v51, %v2023_v8  ;;  %v496_v1 = vpop.f32.mrf.mxu0  ;;  %v525_v21 = vpop.f32.mrf.mxu1  ;;  %v2197_v44 = vadd.f32 %v581_v52, %v2029_v20 }
 0x254   :  { %v2188_v43 = vadd.f32 %v496_v1, %v1995_v58  ;;  %v648_v1 = vadd.f32 %v647_v7, %v2193_v35  ;;  %v2205_v10 = vadd.f32 %v525_v21, %v2018_v37 }
 0x255   :  { %v634_v18 = vadd.f32 %v633_v2, %v2185_v45 }
 0x256   :  { %v641_v51 = vadd.f32 %v640_v36, %v2188_v43  ;;  %v2217_v36 = vadd.f32 %v1986_v56, %v1970_v47  ;;  %v649_v35 = vadd.f32 %v648_v1, %v2209_v48 }
 0x257   :  { %v635_v40 = vadd.f32 %v634_v18, %v2197_v44 }
 0x258   :  { %3024 = vst [vmem:[#allocation22_spill] sm:$0xff] %v2217_v36  ;;  %v642_v18 = vadd.f32 %v641_v51, %v2205_v10  ;;  %v656_v56 = vadd.f32 %v2217_v36, %v2213_v41 }
 0x259   :  { %636 = vadd.xlane.f32.xlu2 %v635_v40 }
 0x25a   :  { %v554_v2 = vpop.f32.mrf.mxu2  ;;  %v583_v52 = vpop.f32.mrf.mxu3 }
 0x25b   :  { %v2221_v21 = vadd.f32 %v554_v2, %v2023_v8  ;;  %v499_v40 = vpop.f32.mrf.mxu0  ;;  %v528_v49 = vpop.f32.mrf.mxu1  ;;  %v2233_v47 = vadd.f32 %v583_v52, %v2029_v20 }
 0x25c   :  { %v2224_v7 = vadd.f32 %v499_v40, %v1995_v58  ;;  %v657_v40 = vadd.f32 %v656_v56, %v2229_v46  ;;  %v2241_v1 = vadd.f32 %v528_v49, %v2018_v37 }
 0x25d   :  { %v643_v55 = vadd.f32 %v642_v18, %v2221_v21  ;;  %v2245_v18 = vadd.f32 %v2000_v25, %v1993_v39 }
 0x25e   :  { %v650_v51 = vadd.f32 %v649_v35, %v2224_v7 }
 0x25f   :  { %v644_v2 = vadd.f32 %v643_v55, %v2233_v47  ;;  %v658_v56 = vadd.f32 %v657_v40, %v2245_v18 }
 0x260   :  { %v651_v52 = vadd.f32 %v650_v51, %v2241_v1 }
 0x261   :  { %645 = vadd.xlane.f32.xlu0 %v644_v2 }
 0x262   :  { %v557_v42 = vpop.f32.mrf.mxu2  ;;  %v586_v61 = vpop.f32.mrf.mxu3 }
 0x263   :  { %v2249_v36 = vadd.f32 %v557_v42, %v2023_v8  ;;  %v501_v35 = vpop.f32.mrf.mxu0  ;;  %v2257_v2 = vadd.f32 %v586_v61, %v2029_v20  ;;  %v530_v46 = vpop.f32.mrf.mxu1 }
 0x264   :  { %v2252_v55 = vadd.f32 %v501_v35, %v1995_v58  ;;  %v2262_v51 = vadd.f32 %v530_v46, %v2018_v37 }
 0x265   :  { %v652_v49 = vadd.f32 %v651_v52, %v2249_v36 }
 0x266   :  { %3026 = vst [vmem:[#allocation24_spill] sm:$0xff] %v2252_v55  ;;  %v659_v39 = vadd.f32 %v658_v56, %v2252_v55  ;;  %v1614_v56 = vmov 1024.0  }
 0x267   :  { %v653_v25 = vadd.f32 %v652_v49, %v2257_v2  ;;  %1513 = vrcp.f32 %v1614_v56 }
 0x268   :  { %v660_v58 = vadd.f32 %v659_v39, %v2262_v51 }
 0x269   :  { %654 = vadd.xlane.f32.xlu1 %v653_v25 }
 0x26a   :  { %v559_v42 = vpop.f32.mrf.mxu2  ;;  %v588_v41 = vpop.f32.mrf.mxu3 }
 0x26b   :  { %v2266_v40 = vadd.f32 %v559_v42, %v2023_v8  ;;  %v2270_v61 = vadd.f32 %v588_v41, %v2029_v20 }
 0x26d   :  { %v661_v52 = vadd.f32 %v660_v58, %v2266_v40  ;;  %v1514_v37 = vpop.eup %1513 }
 0x26e   :  { %v666_v46 = vmul.f32 1024.0, %v1514_v37  ;;  %vm670_vm0 = vweird.f32 %v1514_v37 }
 0x26f   :  { %v662_v35 = vadd.f32 %v661_v52, %v2270_v61 }
 0x270   :  { %v667_v49 = vsub.f32 1.0, %v666_v46 }
 0x271   :  { %663 = vadd.xlane.f32.xlu2 %v662_v35 }
 0x272   :  { %v668_v25 = vmul.f32 %v1514_v37, %v667_v49 }
 0x274   :  { %v669_v55 = vadd.f32 %v1514_v37, %v668_v25 }
 0x276   :  { %v2273_v39 = vsel %vm670_vm0, %v1514_v37, %v669_v55 }
 0x2ac   :  { %v601_v8 = vpop.xlane.xlu1 %600 }
 0x2ad   :  { %v672_v42 = vmul.f32 %v2273_v39, %v601_v8 }
 0x2af   :  { %v2277_v58 = vsub.f32 %v1979_v53, %v672_v42  ;;  %v2280_v20 = vsub.f32 %v1982_v54, %v672_v42  ;;  %v2283_v41 = vsub.f32 %v1989_v57, %v672_v42  ;;  %v2286_v52 = vsub.f32 %v2003_v62, %v672_v42 }
 0x2b0   :  { %v2293_v56 = vsub.f32 %v2012_v3, %v672_v42  ;;  %v2298_v57 = vsub.f32 %v2027_v11, %v672_v42  ;;  %v2304_v25 = vsub.f32 %v2042_v50, %v672_v42 }
 0x2b1   :  { %3027 = vst [vmem:[#allocation25_spill] sm:$0xff] %v2283_v41  ;;  %v744_v35 = vmul.f32 %v2277_v58, %v2277_v58  ;;  %v745_v55 = vmul.f32 %v2280_v20, %v2280_v20  ;;  %v746_v53 = vmul.f32 %v2283_v41, %v2283_v41  ;;  %v747_v46 = vmul.f32 %v2286_v52, %v2286_v52 }
 0x2b2   :  { %v748_v3 = vmul.f32 %v2293_v56, %v2293_v56  ;;  %v749_v50 = vmul.f32 %v2298_v57, %v2298_v57 }
 0x2b3   :  { %v808_v54 = vadd.f32 %v745_v55, %v744_v35  ;;  %v2318_v55 = vsub.f32 %v2053_v22, %v672_v42 }
 0x2b4   :  { %v610_v37 = vpop.xlane.xlu2 %609 }
 0x2b5   :  { %v673_v62 = vmul.f32 %v2273_v39, %v610_v37  ;;  %v809_v49 = vadd.f32 %v808_v54, %v746_v53 }
 0x2b7   :  { %v810_v8 = vadd.f32 %v809_v49, %v747_v46  ;;  %v2309_v41 = vsub.f32 %v2006_v63, %v673_v62  ;;  %v2312_v35 = vsub.f32 %v2009_v0, %v673_v62  ;;  %v2315_v11 = vsub.f32 %v2016_v5, %v673_v62 }
 0x2b8   :  { %v2323_v54 = vsub.f32 %v2032_v12, %v673_v62  ;;  %v2330_v37 = vsub.f32 %v2045_v60, %v673_v62  ;;  %v750_v5 = vmul.f32 %v2304_v25, %v2304_v25  ;;  %v751_v12 = vmul.f32 %v2318_v55, %v2318_v55 }
 0x2b9   :  { %3028 = vst [vmem:[#allocation26_spill] sm:$0xff] %v2309_v41  ;;  %v811_v53 = vadd.f32 %v810_v8, %v748_v3  ;;  %v752_v63 = vmul.f32 %v2309_v41, %v2309_v41  ;;  %v753_v0 = vmul.f32 %v2312_v35, %v2312_v35  ;;  %v754_v42 = vmul.f32 %v2315_v11, %v2315_v11 }
 0x2ba   :  { %3029 = vst [vmem:[#allocation27_spill] sm:$0xff] %v2312_v35  ;;  %v2339_v3 = vsub.f32 %v2061_v59, %v673_v62  ;;  %v755_v60 = vmul.f32 %v2323_v54, %v2323_v54 }
 0x2bb   :  { %3030 = vst [vmem:[#allocation28_spill] sm:$0xff] %v2315_v11  ;;  %v812_v22 = vadd.f32 %v811_v53, %v749_v50  ;;  %v817_v46 = vadd.f32 %v753_v0, %v752_v63  ;;  %v2345_v50 = vsub.f32 %v2077_v9, %v673_v62  ;;  %v756_v53 = vmul.f32 %v2330_v37, %v2330_v37 }
 0x2bc   :  { %v619_v49 = vpop.xlane.xlu0 %618  ;;  %v757_v9 = vmul.f32 %v2339_v3, %v2339_v3 }
 0x2bd   :  { %v674_v8 = vmul.f32 %v2273_v39, %v619_v49  ;;  %v813_v35 = vadd.f32 %v812_v22, %v750_v5  ;;  %v818_v41 = vadd.f32 %v817_v46, %v754_v42  ;;  %v2359_v22 = vsub.f32 %v2089_v29, %v673_v62 }
 0x2bf   :  { %v814_v63 = vadd.f32 %v813_v35, %v751_v12  ;;  %v819_v0 = vadd.f32 %v818_v41, %v755_v60  ;;  %v2350_v11 = vsub.f32 %v2035_v15, %v674_v8  ;;  %v2353_v59 = vsub.f32 %v2038_v16, %v674_v8 }
 0x2c0   :  { %v2356_v5 = vsub.f32 %v2049_v19, %v674_v8  ;;  %v2366_v15 = vsub.f32 %v2065_v26, %v674_v8  ;;  %v758_v19 = vmul.f32 %v2345_v50, %v2345_v50  ;;  %v2373_v29 = vsub.f32 %v2080_v27, %v674_v8 }
 0x2c1   :  { %815 = vadd.xlane.f32.xlu0 %v814_v63  ;;  %v820_v42 = vadd.f32 %v819_v0, %v756_v53  ;;  %v760_v41 = vmul.f32 %v2350_v11, %v2350_v11  ;;  %v761_v16 = vmul.f32 %v2353_v59, %v2353_v59  ;;  %v759_v26 = vmul.f32 %v2359_v22, %v2359_v22 }
 0x2c2   :  { %v762_v62 = vmul.f32 %v2356_v5, %v2356_v5  ;;  %v2381_v53 = vsub.f32 %v2097_v24, %v674_v8  ;;  %v763_v63 = vmul.f32 %v2366_v15, %v2366_v15  ;;  %v764_v24 = vmul.f32 %v2373_v29, %v2373_v29 }
 0x2c3   :  { %v821_v35 = vadd.f32 %v820_v42, %v757_v9  ;;  %v826_v49 = vadd.f32 %v761_v16, %v760_v41  ;;  %v2395_v16 = vsub.f32 %v2113_v13, %v674_v8 }
 0x2c4   :  { %v628_v46 = vpop.xlane.xlu1 %627  ;;  %v765_v13 = vmul.f32 %v2381_v53, %v2381_v53 }
 0x2c5   :  { %v675_v12 = vmul.f32 %v2273_v39, %v628_v46  ;;  %v822_v60 = vadd.f32 %v821_v35, %v758_v19  ;;  %v827_v0 = vadd.f32 %v826_v49, %v762_v62  ;;  %v3034_v35 = vld [vmem:[#allocation11_spill] sm:$0xff] }
 0x2c7   :  { %v823_v9 = vadd.f32 %v822_v60, %v759_v26  ;;  %v2386_v27 = vsub.f32 %v2069_v4, %v675_v12  ;;  %v2389_v42 = vsub.f32 %v2073_v6, %v675_v12  ;;  %v2392_v41 = vsub.f32 %v2085_v28, %v675_v12 }
 0x2c8   :  { %v828_v19 = vadd.f32 %v827_v0, %v763_v63  ;;  %v2400_v46 = vsub.f32 %v3034_v35, %v675_v12  ;;  %v2407_v28 = vsub.f32 %v2125_v32, %v674_v8  ;;  %v2412_v49 = vsub.f32 %v2116_v30, %v675_v12 }
 0x2c9   :  { %3031 = vst [vmem:[#allocation29_spill] sm:$0xff] %v2386_v27  ;;  %824 = vadd.xlane.f32.xlu1 %v823_v9  ;;  %v768_v4 = vmul.f32 %v2386_v27, %v2386_v27  ;;  %v769_v6 = vmul.f32 %v2389_v42, %v2389_v42  ;;  %v770_v26 = vmul.f32 %v2392_v41, %v2392_v41 }
 0x2ca   :  { %3032 = vst [vmem:[#allocation30_spill] sm:$0xff] %v2389_v42  ;;  %v829_v62 = vadd.f32 %v828_v19, %v764_v24  ;;  %v766_v0 = vmul.f32 %v2395_v16, %v2395_v16  ;;  %v2420_v32 = vsub.f32 %v2133_v23, %v675_v12  ;;  %v771_v8 = vmul.f32 %v2400_v46, %v2400_v46  ;;  %v3041_v23 = vld [vmem:[#allocation13_spill] sm:$0xff] }
 0x2cb   :  { %3033 = vst [vmem:[#allocation31_spill] sm:$0xff] %v2392_v41  ;;  %v835_v60 = vadd.f32 %v769_v6, %v768_v4  ;;  %v767_v30 = vmul.f32 %v2407_v28, %v2407_v28  ;;  %v2427_v4 = vsub.f32 %v2149_v17, %v675_v12  ;;  %v772_v6 = vmul.f32 %v2412_v49, %v2412_v49 }
 0x2cc   :  { %3035 = vst [vmem:[#allocation11_spill] sm:$0xff] %v2400_v46  ;;  %v637_v63 = vpop.xlane.xlu2 %636  ;;  %v830_v9 = vadd.f32 %v829_v62, %v765_v13  ;;  %v3039_v62 = vld [vmem:[#allocation12_spill] sm:$0xff]  ;;  %v3043_v46 = vld [vmem:[#allocation14_spill] sm:$0xff]  ;;  %v773_v17 = vmul.f32 %v2420_v32, %v2420_v32 }
 0x2cd   :  { %3036 = vst [vmem:[#allocation32_spill] sm:$0xff] %v2412_v49  ;;  %v676_v35 = vmul.f32 %v2273_v39, %v637_v63  ;;  %v836_v24 = vadd.f32 %v835_v60, %v770_v26  ;;  %v2441_v60 = vsub.f32 %v2161_v38, %v675_v12 }
 0x2ce   :  { %3037 = vst [vmem:[#allocation33_spill] sm:$0xff] %v2420_v32  ;;  %v831_v19 = vadd.f32 %v830_v9, %v766_v0 }
 0x2cf   :  { %3038 = vst [vmem:[#allocation34_spill] sm:$0xff] %v2427_v4  ;;  %v837_v13 = vadd.f32 %v836_v24, %v771_v8  ;;  %v2432_v63 = vsub.f32 %v3039_v62, %v676_v35  ;;  %v2435_v41 = vsub.f32 %v3041_v23, %v676_v35  ;;  %v2438_v26 = vsub.f32 %v3043_v46, %v676_v35  ;;  %v3046_v8 = vld [vmem:[#allocation15_spill] sm:$0xff] }
 0x2d0   :  { %v832_v42 = vadd.f32 %v831_v19, %v767_v30  ;;  %3045 = vst [vmem:[#allocation35_spill] sm:$0xff] %v2441_v60  ;;  %v2448_v24 = vsub.f32 %v3046_v8, %v676_v35  ;;  %v774_v46 = vmul.f32 %v2427_v4, %v2427_v4  ;;  %v2455_v12 = vsub.f32 %v2152_v34, %v676_v35  ;;  %v3050_v34 = vld [vmem:[#allocation16_spill] sm:$0xff]  ;;  %v3052_v4 = vld [vmem:[#allocation17_spill] sm:$0xff] }
 0x2d1   :  { %3040 = vst [vmem:[#allocation12_spill] sm:$0xff] %v2432_v63  ;;  %v838_v0 = vadd.f32 %v837_v13, %v772_v6  ;;  %v776_v9 = vmul.f32 %v2432_v63, %v2432_v63  ;;  %v777_v30 = vmul.f32 %v2435_v41, %v2435_v41  ;;  %v778_v6 = vmul.f32 %v2438_v26, %v2438_v26 }
 0x2d2   :  { %3042 = vst [vmem:[#allocation13_spill] sm:$0xff] %v2435_v41  ;;  %833 = vadd.xlane.f32.xlu2 %v832_v42  ;;  %v775_v62 = vmul.f32 %v2441_v60, %v2441_v60  ;;  %v2463_v8 = vsub.f32 %v2169_v14, %v676_v35  ;;  %v780_v14 = vmul.f32 %v2455_v12, %v2455_v12  ;;  %v1209_v60 = vld [vmem:[#allocation5 + $0x38] sm:$0xff] }
 0x2d3   :  { %3044 = vst [vmem:[#allocation14_spill] sm:$0xff] %v2438_v26  ;;  %v839_v19 = vadd.f32 %v838_v0, %v773_v17  ;;  %v844_v13 = vadd.f32 %v777_v30, %v776_v9  ;;  %v779_v17 = vmul.f32 %v2448_v24, %v2448_v24  ;;  %v3054_v9 = vld [vmem:[#allocation18_spill] sm:$0xff] }
 0x2d4   :  { %3047 = vst [vmem:[#allocation15_spill] sm:$0xff] %v2448_v24  ;;  %v646_v38 = vpop.xlane.xlu0 %645  ;;  %v1208_v24 = vld [vmem:[#allocation5 + $0x30] sm:$0xff] }
 0x2d5   :  { %3048 = vst [vmem:[#allocation36_spill] sm:$0xff] %v2455_v12  ;;  %v677_v42 = vmul.f32 %v2273_v39, %v646_v38  ;;  %v840_v23 = vadd.f32 %v839_v19, %v774_v46  ;;  %v845_v0 = vadd.f32 %v844_v13, %v778_v6  ;;  %v2477_v38 = vsub.f32 %v2185_v45, %v676_v35  ;;  %v3057_v19 = vld [vmem:[#allocation19_spill] sm:$0xff] }
 0x2d6   :  { %3049 = vst [vmem:[#allocation37_spill] sm:$0xff] %v2463_v8  ;;  %v781_v45 = vmul.f32 %v2463_v8, %v2463_v8 }
 0x2d7   :  { %v841_v41 = vadd.f32 %v840_v23, %v775_v62  ;;  %v2468_v63 = vsub.f32 %v3050_v34, %v677_v42  ;;  %v2471_v26 = vsub.f32 %v3052_v4, %v677_v42  ;;  %v2474_v30 = vsub.f32 %v3054_v9, %v677_v42  ;;  %3056 = vst [vmem:[#allocation38_spill] sm:$0xff] %v2477_v38 }
 0x2d8   :  { %v846_v46 = vadd.f32 %v845_v0, %v779_v17  ;;  %v2482_v6 = vsub.f32 %v3057_v19, %v677_v42  ;;  %v2489_v62 = vsub.f32 %v2197_v44, %v676_v35  ;;  %v2494_v34 = vsub.f32 %v2188_v43, %v677_v42 }
 0x2d9   :  { %3051 = vst [vmem:[#allocation16_spill] sm:$0xff] %v2468_v63  ;;  %842 = vadd.xlane.f32.xlu0 %v841_v41  ;;  %v784_v13 = vmul.f32 %v2468_v63, %v2468_v63  ;;  %v785_v4 = vmul.f32 %v2471_v26, %v2471_v26  ;;  %v786_v41 = vmul.f32 %v2474_v30, %v2474_v30  ;;  %v1204_v63 = vld [vmem:[#allocation5 + $0x10] sm:$0xff] }
 0x2da   :  { %3053 = vst [vmem:[#allocation17_spill] sm:$0xff] %v2471_v26  ;;  %v847_v23 = vadd.f32 %v846_v46, %v780_v14  ;;  %v782_v9 = vmul.f32 %v2477_v38, %v2477_v38  ;;  %v2502_v44 = vsub.f32 %v2205_v10, %v677_v42  ;;  %v787_v35 = vmul.f32 %v2482_v6, %v2482_v6 }
 0x2db   :  { %3055 = vst [vmem:[#allocation18_spill] sm:$0xff] %v2474_v30  ;;  %v853_v17 = vadd.f32 %v785_v4, %v784_v13  ;;  %v783_v43 = vmul.f32 %v2489_v62, %v2489_v62  ;;  %v2509_v13 = vsub.f32 %v2221_v21, %v677_v42  ;;  %v788_v4 = vmul.f32 %v2494_v34, %v2494_v34  ;;  %v1202_v30 = vld [vmem:[#allocation5] sm:$0xff] }
 0x2dc   :  { %3058 = vst [vmem:[#allocation19_spill] sm:$0xff] %v2482_v6  ;;  %v655_v0 = vpop.xlane.xlu1 %654  ;;  %v848_v19 = vadd.f32 %v847_v23, %v781_v45  ;;  %v3065_v6 = vld [vmem:[#allocation20_spill] sm:$0xff]  ;;  %v789_v21 = vmul.f32 %v2502_v44, %v2502_v44 }
 0x2dd   :  { %3059 = vst [vmem:[#allocation39_spill] sm:$0xff] %v2489_v62  ;;  %v678_v26 = vmul.f32 %v2273_v39, %v655_v0  ;;  %v854_v14 = vadd.f32 %v853_v17, %v786_v41  ;;  %v2523_v17 = vsub.f32 %v2233_v47, %v677_v42  ;;  %v1206_v62 = vld [vmem:[#allocation5 + $0x20] sm:$0xff] }
 0x2de   :  { %3060 = vst [vmem:[#allocation40_spill] sm:$0xff] %v2494_v34  ;;  %v849_v46 = vadd.f32 %v848_v19, %v782_v9 }
 0x2df   :  { %3061 = vst [vmem:[#allocation41_spill] sm:$0xff] %v2502_v44  ;;  %v855_v45 = vadd.f32 %v854_v14, %v787_v35  ;;  %v2514_v23 = vsub.f32 %v2177_v33, %v678_v26  ;;  %v2517_v10 = vsub.f32 %v2181_v31, %v678_v26  ;;  %v2520_v41 = vsub.f32 %v3065_v6, %v678_v26 }
 0x2e0   :  { %3062 = vst [vmem:[#allocation42_spill] sm:$0xff] %v2509_v13  ;;  %v850_v0 = vadd.f32 %v849_v46, %v783_v43  ;;  %v2530_v33 = vsub.f32 %v2209_v48, %v678_v26  ;;  %v790_v6 = vmul.f32 %v2509_v13, %v2509_v13  ;;  %v2537_v42 = vsub.f32 %v2224_v7, %v678_v26  ;;  %v3071_v7 = vld [vmem:[#allocation21_spill] sm:$0xff] }
 0x2e1   :  { %3063 = vst [vmem:[#allocation43_spill] sm:$0xff] %v2514_v23  ;;  %v856_v9 = vadd.f32 %v855_v45, %v788_v4  ;;  %v792_v19 = vmul.f32 %v2514_v23, %v2514_v23  ;;  %v793_v31 = vmul.f32 %v2517_v10, %v2517_v10  ;;  %v794_v14 = vmul.f32 %v2520_v41, %v2520_v41  ;;  %v3073_v23 = vld [vmem:[#allocation22_spill] sm:$0xff] }
 0x2e2   :  { %3064 = vst [vmem:[#allocation44_spill] sm:$0xff] %v2517_v10  ;;  %851 = vadd.xlane.f32.xlu1 %v850_v0  ;;  %v791_v48 = vmul.f32 %v2523_v17, %v2523_v17  ;;  %v2545_v45 = vsub.f32 %v2241_v1, %v678_v26  ;;  %v795_v0 = vmul.f32 %v2530_v33, %v2530_v33 }
 0x2e3   :  { %3066 = vst [vmem:[#allocation20_spill] sm:$0xff] %v2520_v41  ;;  %v857_v35 = vadd.f32 %v856_v9, %v789_v21  ;;  %v862_v43 = vadd.f32 %v793_v31, %v792_v19  ;;  %v3075_v19 = vld [vmem:[#allocation23_spill] sm:$0xff]  ;;  %v796_v1 = vmul.f32 %v2537_v42, %v2537_v42 }
 0x2e4   :  { %3067 = vst [vmem:[#allocation45_spill] sm:$0xff] %v2523_v17  ;;  %v664_v47 = vpop.xlane.xlu2 %663 }
 0x2e5   :  { %3068 = vst [vmem:[#allocation46_spill] sm:$0xff] %v2530_v33  ;;  %v679_v46 = vmul.f32 %v2273_v39, %v664_v47  ;;  %v858_v4 = vadd.f32 %v857_v35, %v790_v6  ;;  %v863_v21 = vadd.f32 %v862_v43, %v794_v14  ;;  %v2559_v47 = vsub.f32 %v2249_v36, %v678_v26  ;;  %v3085_v33 = vld [vmem:[#allocation25_spill] sm:$0xff] }
 0x2e6   :  { %3069 = vst [vmem:[#allocation47_spill] sm:$0xff] %v2537_v42  ;;  %v2571_v43 = vsub.f32 %v2257_v2, %v678_v26  ;;  %v797_v36 = vmul.f32 %v2545_v45, %v2545_v45 }
 0x2e7   :  { %3070 = vst [vmem:[#allocation48_spill] sm:$0xff] %v2545_v45  ;;  %v859_v9 = vadd.f32 %v858_v4, %v791_v48  ;;  %v2550_v10 = vsub.f32 %v3071_v7, %v679_v46  ;;  %v2553_v41 = vsub.f32 %v3073_v23, %v679_v46  ;;  %v2556_v31 = vsub.f32 %v3075_v19, %v679_v46  ;;  %v3080_v4 = vld [vmem:[#allocation24_spill] sm:$0xff] }
 0x2e8   :  { %3077 = vst [vmem:[#allocation49_spill] sm:$0xff] %v2559_v47  ;;  %v864_v6 = vadd.f32 %v863_v21, %v795_v0  ;;  %v2564_v35 = vsub.f32 %v2245_v18, %v679_v46  ;;  %v2576_v7 = vsub.f32 %v3080_v4, %v679_v46  ;;  %v798_v21 = vmul.f32 %v2559_v47, %v2559_v47 }
 0x2e9   :  { %3072 = vst [vmem:[#allocation21_spill] sm:$0xff] %v2550_v10  ;;  %860 = vadd.xlane.f32.xlu2 %v859_v9  ;;  %v800_v14 = vmul.f32 %v2550_v10, %v2550_v10  ;;  %v801_v23 = vmul.f32 %v2553_v41, %v2553_v41  ;;  %v802_v18 = vmul.f32 %v2556_v31, %v2556_v31 }
 0x2ea   :  { %3074 = vst [vmem:[#allocation22_spill] sm:$0xff] %v2553_v41  ;;  %v865_v48 = vadd.f32 %v864_v6, %v796_v1  ;;  %v2583_v19 = vsub.f32 %v2262_v51, %v679_v46  ;;  %v803_v2 = vmul.f32 %v2564_v35, %v2564_v35  ;;  %v799_v1 = vmul.f32 %v2571_v43, %v2571_v43 }
 0x2eb   :  { %3076 = vst [vmem:[#allocation23_spill] sm:$0xff] %v2556_v31  ;;  %v871_v0 = vadd.f32 %v801_v23, %v800_v14  ;;  %v2590_v4 = vsub.f32 %v2266_v40, %v679_v46  ;;  %v804_v14 = vmul.f32 %v2576_v7, %v2576_v7 }
 0x2ec   :  { %3078 = vst [vmem:[#allocation50_spill] sm:$0xff] %v2564_v35  ;;  %v866_v9 = vadd.f32 %v865_v48, %v797_v36  ;;  %v2595_v36 = vsub.f32 %v2270_v61, %v679_v46  ;;  %v805_v51 = vmul.f32 %v2583_v19, %v2583_v19 }
 0x2ed   :  { %3079 = vst [vmem:[#allocation51_spill] sm:$0xff] %v2571_v43  ;;  %v872_v26 = vadd.f32 %v871_v0, %v802_v18  ;;  %v806_v18 = vmul.f32 %v2590_v4, %v2590_v4 }
 0x2ee   :  { %3081 = vst [vmem:[#allocation24_spill] sm:$0xff] %v2576_v7  ;;  %v867_v6 = vadd.f32 %v866_v9, %v798_v21  ;;  %v807_v40 = vmul.f32 %v2595_v36, %v2595_v36 }
 0x2ef   :  { %3082 = vst [vmem:[#allocation52_spill] sm:$0xff] %v2583_v19  ;;  %v873_v23 = vadd.f32 %v872_v26, %v803_v2 }
 0x2f0   :  { %3083 = vst [vmem:[#allocation53_spill] sm:$0xff] %v2590_v4  ;;  %v868_v31 = vadd.f32 %v867_v6, %v799_v1 }
 0x2f1   :  { %3084 = vst [vmem:[#allocation54_spill] sm:$0xff] %v2595_v36  ;;  %v874_v48 = vadd.f32 %v873_v23, %v804_v14  ;;  %v591_v23 = vld [vmem:[%s2947_s5] sm:$0xff]  ;;  %s1615_s5 = smov [#allocation7]  }
 0x2f2   :  { %869 = vadd.xlane.f32.xlu0 %v868_v31  ;;  %v2628_v19 = vperm.slane %v591_v23, 7  ;;  %s1398_s21 = sshll.u32 %s1615_s5, 4  ;;  %s1399_s21 = int_to_ptr.vmem [resolvable:$true] %s1398_s21 }
 0x2f3   :  { %v875_v0 = vadd.f32 %v874_v48, %v805_v51  ;;  %v592_v48 = vld [vmem:[#allocation2] sm:$0xff] }
 0x2f4   :  { %v2632_v7 = vperm.slane %v592_v48, 1  ;;  %v2634_v35 = vperm.slane %v592_v48, 2  ;;  %v2644_v47 = vperm.slane %v592_v48, 5  ;;  %v2649_v45 = vperm.slane %v592_v48, 7 }
 0x2f5   :  { %v876_v21 = vadd.f32 %v875_v0, %v806_v18  ;;  %v2611_v18 = vperm.slane %v591_v23, 0  ;;  %v2613_v0 = vperm.slane %v591_v23, 1 }
 0x2f7   :  { %v877_v9 = vadd.f32 %v876_v21, %v807_v40  ;;  %v2615_v21 = vperm.slane %v591_v23, 2 }
 0x2f9   :  { %878 = vadd.xlane.f32.xlu1 %v877_v9  ;;  %v2617_v9 = vperm.slane %v591_v23, 3 }
 0x334   :  { %v816_v2 = vpop.xlane.xlu0 %815 }
 0x335   :  { %v880_v26 = vmul.f32 %v816_v2, %v2273_v39  ;;  %v2619_v2 = vperm.slane %v591_v23, 4 }
 0x337   :  { %v888_v61 = vadd.f32 1e-05, %v880_v26  ;;  %v2621_v26 = vperm.slane %v591_v23, 5 }
 0x339   :  { %1515 = vrsqrt.f32 %v888_v61  ;;  %vm902_vm12 = vweird.f32 %v888_v61 }
 0x33c   :  { %v825_v46 = vpop.xlane.xlu1 %824 }
 0x33d   :  { %v881_v1 = vmul.f32 %v825_v46, %v2273_v39 }
 0x33f   :  { %v1516_v6 = vpop.eup %1515  ;;  %v2605_v31 = vadd.f32 1e-05, %v881_v1  ;;  %v2623_v1 = vperm.slane %v591_v23, 6  ;;  %v2646_v23 = vperm.slane %v592_v48, 6 }
 0x340   :  { %v897_v14 = vmul.f32 %v1516_v6, %v888_v61  ;;  %vm903_vm11 = vweird.f32 %v1516_v6 }
 0x341   :  { %1517 = vrsqrt.f32 %v2605_v31  ;;  %vm904_vm13 = vmor %vm902_vm12, %vm903_vm11  ;;  %vm912_vm15 = vweird.f32 %v2605_v31 }
 0x342   :  { %v898_v51 = vmul.f32 %v1516_v6, %v897_v14 }
 0x344   :  { %v899_v40 = vmul.f32 0.5, %v898_v51  ;;  %v2630_v51 = vperm.slane %v592_v48, 0 }
 0x345   :  { %v834_v46 = vpop.xlane.xlu2 %833 }
 0x346   :  { %v900_v36 = vsub.f32 1.5, %v899_v40  ;;  %v882_v14 = vmul.f32 %v834_v46, %v2273_v39  ;;  %v2640_v40 = vperm.slane %v592_v48, 3  ;;  %v2642_v46 = vperm.slane %v592_v48, 4 }
 0x347   :  { %v2626_v4 = vpop.eup %1517 }
 0x348   :  { %v901_v41 = vmul.f32 %v1516_v6, %v900_v36  ;;  %v907_v10 = vmul.f32 %v2626_v4, %v2605_v31  ;;  %v2638_v43 = vadd.f32 1e-05, %v882_v14  ;;  %vm913_vm14 = vweird.f32 %v2626_v4 }
 0x349   :  { %vm914_vm1 = vmor %vm912_vm15, %vm913_vm14 }
 0x34a   :  { %v905_v42 = vsel %vm904_vm13, %v1516_v6, %v901_v41  ;;  %v908_v36 = vmul.f32 %v2626_v4, %v907_v10  ;;  %1519 = vrsqrt.f32 %v2638_v43  ;;  %vm922_vm3 = vweird.f32 %v2638_v43 }
 0x34b   :  { %v976_v61 = vmul.f32 %v905_v42, %v2277_v58  ;;  %v977_v14 = vmul.f32 %v905_v42, %v2280_v20  ;;  %v978_v17 = vmul.f32 %v905_v42, %v3085_v33  ;;  %v979_v13 = vmul.f32 %v905_v42, %v2286_v52  ;;  %v1203_v33 = vld [vmem:[#allocation5 + $0x8] sm:$0xff] }
 0x34c   :  { %v980_v44 = vmul.f32 %v905_v42, %v2293_v56  ;;  %v981_v34 = vmul.f32 %v905_v42, %v2298_v57  ;;  %v982_v48 = vmul.f32 %v905_v42, %v2304_v25  ;;  %v983_v41 = vmul.f32 %v905_v42, %v2318_v55  ;;  %v1205_v55 = vld [vmem:[#allocation5 + $0x18] sm:$0xff]  ;;  %v843_v38 = vpop.xlane.xlu0 %842 }
 0x34d   :  { %v1057_v10 = vmul.f32 %v2611_v18, %v976_v61  ;;  %v1058_v6 = vmul.f32 %v2613_v0, %v977_v14  ;;  %v1059_v58 = vmul.f32 %v2615_v21, %v978_v17  ;;  %v1060_v20 = vmul.f32 %v2617_v9, %v979_v13 }
 0x34e   :  { %v1061_v52 = vmul.f32 %v2619_v2, %v980_v44  ;;  %v1062_v56 = vmul.f32 %v2621_v26, %v981_v34  ;;  %v1063_v57 = vmul.f32 %v2623_v1, %v982_v48  ;;  %v1064_v25 = vmul.f32 %v2628_v19, %v983_v41  ;;  %v1207_v48 = vld [vmem:[#allocation5 + $0x28] sm:$0xff] }
 0x34f   :  { %v1138_v42 = vadd.f32 %v2630_v51, %v1057_v10  ;;  %v1139_v61 = vadd.f32 %v2632_v7, %v1058_v6  ;;  %v1140_v17 = vadd.f32 %v2634_v35, %v1059_v58  ;;  %v1141_v13 = vadd.f32 %v2640_v40, %v1060_v20 }
 0x350   :  { %v2673_v14 = vpop.eup %1519  ;;  %v1142_v44 = vadd.f32 %v2642_v46, %v1061_v52  ;;  %v1143_v34 = vadd.f32 %v2644_v47, %v1062_v56  ;;  %v1144_v41 = vadd.f32 %v2646_v23, %v1063_v57  ;;  %v1145_v6 = vadd.f32 %v2649_v45, %v1064_v25  ;;  %v3087_v25 = vld [vmem:[#allocation27_spill] sm:$0xff] }
 0x351   :  { %v1266_v8 = vadd.f32 %v1202_v30, %v1138_v42  ;;  %v1267_v12 = vadd.f32 %v1203_v33, %v1139_v61  ;;  %v1268_v10 = vadd.f32 %v1204_v63, %v1140_v17  ;;  %v1269_v58 = vadd.f32 %v1205_v55, %v1141_v13  ;;  %v3088_v42 = vld [vmem:[#allocation28_spill] sm:$0xff] }
 0x352   :  { %v1270_v20 = vadd.f32 %v1206_v62, %v1142_v44  ;;  %v909_v32 = vmul.f32 0.5, %v908_v36  ;;  %v917_v52 = vmul.f32 %v2673_v14, %v2638_v43  ;;  %v883_v56 = vmul.f32 %v843_v38, %v2273_v39 }
 0x353   :  { %1330 = vst [vmem:[#allocation7] sm:$0xff] %v1266_v8  ;;  %v1271_v49 = vadd.f32 %v1207_v48, %v1143_v34  ;;  %v1272_v27 = vadd.f32 %v1208_v24, %v1144_v41  ;;  %v1273_v33 = vadd.f32 %v1209_v60, %v1145_v6  ;;  %vm923_vm2 = vweird.f32 %v2673_v14  ;;  %v1210_v41 = vld [vmem:[#allocation5 + $0x40] sm:$0xff]  ;;  %v1212_v6 = vld [vmem:[#allocation5 + $0x50] sm:$0xff] }
 0x354   :  { %1331 = vst [vmem:[#allocation7 + $0x8] sm:$0xff] %v1267_v12  ;;  %v910_v30 = vsub.f32 1.5, %v909_v32  ;;  %v918_v63 = vmul.f32 %v2673_v14, %v917_v52  ;;  %v2684_v57 = vadd.f32 1e-05, %v883_v56  ;;  %v3086_v12 = vld [vmem:[#allocation26_spill] sm:$0xff]  ;;  %vm924_vm4 = vmor %vm922_vm3, %vm923_vm2 }
 0x355   :  { %1332 = vst [vmem:[#allocation7 + $0x10] sm:$0xff] %v1268_v10  ;;  %v852_v8 = vpop.xlane.xlu1 %851  ;;  %v1211_v10 = vld [vmem:[#allocation5 + $0x48] sm:$0xff] }
 0x356   :  { %1333 = vst [vmem:[#allocation7 + $0x18] sm:$0xff] %v1269_v58  ;;  %v911_v62 = vmul.f32 %v2626_v4, %v910_v30  ;;  %v919_v38 = vmul.f32 0.5, %v918_v63  ;;  %1521 = vrsqrt.f32 %v2684_v57  ;;  %v884_v60 = vmul.f32 %v852_v8, %v2273_v39  ;;  %v1214_v63 = vld [vmem:[#allocation5 + $0x60] sm:$0xff] }
 0x357   :  { %1334 = vst [vmem:[#allocation7 + $0x20] sm:$0xff] %v1270_v20  ;;  %vm932_vm6 = vweird.f32 %v2684_v57 }
 0x358   :  { %1335 = vst [vmem:[#allocation7 + $0x28] sm:$0xff] %v1271_v49  ;;  %v915_v32 = vsel %vm914_vm1, %v2626_v4, %v911_v62  ;;  %v920_v24 = vsub.f32 1.5, %v919_v38  ;;  %v2717_v38 = vadd.f32 1e-05, %v884_v60 }
 0x359   :  { %1336 = vst [vmem:[#allocation7 + $0x30] sm:$0xff] %v1272_v27  ;;  %v984_v36 = vmul.f32 %v915_v32, %v3086_v12  ;;  %v985_v55 = vmul.f32 %v915_v32, %v3087_v25  ;;  %v986_v31 = vmul.f32 %v915_v32, %v3088_v42  ;;  %v987_v49 = vmul.f32 %v915_v32, %v2323_v54  ;;  %v1216_v12 = vld [vmem:[#allocation5 + $0x70] sm:$0xff] }
 0x35a   :  { %1337 = vst [vmem:[#allocation7 + $0x38] sm:$0xff] %v1273_v33  ;;  %v988_v61 = vmul.f32 %v915_v32, %v2330_v37  ;;  %v989_v27 = vmul.f32 %v915_v32, %v2339_v3  ;;  %v990_v4 = vmul.f32 %v915_v32, %v2345_v50  ;;  %v991_v17 = vmul.f32 %v915_v32, %v2359_v22  ;;  %v1213_v22 = vld [vmem:[#allocation5 + $0x58] sm:$0xff]  ;;  %v1215_v32 = vld [vmem:[#allocation5 + $0x68] sm:$0xff] }
 0x35b   :  { %v1065_v13 = vmul.f32 %v2611_v18, %v984_v36  ;;  %v1066_v44 = vmul.f32 %v2613_v0, %v985_v55  ;;  %v1067_v34 = vmul.f32 %v2615_v21, %v986_v31  ;;  %v1068_v48 = vmul.f32 %v2617_v9, %v987_v49  ;;  %v1217_v31 = vld [vmem:[#allocation5 + $0x78] sm:$0xff] }
 0x35c   :  { %v1069_v54 = vmul.f32 %v2619_v2, %v988_v61  ;;  %v1070_v37 = vmul.f32 %v2621_v26, %v989_v27  ;;  %v1071_v3 = vmul.f32 %v2623_v1, %v990_v4  ;;  %v1072_v50 = vmul.f32 %v2628_v19, %v991_v17  ;;  %v2712_v30 = vpop.eup %1521 }
 0x35d   :  { %v1146_v58 = vadd.f32 %v2630_v51, %v1065_v13  ;;  %v1147_v20 = vadd.f32 %v2632_v7, %v1066_v44  ;;  %v1148_v52 = vadd.f32 %v2634_v35, %v1067_v34  ;;  %v1149_v56 = vadd.f32 %v2640_v40, %v1068_v48 }
 0x35e   :  { %v1150_v33 = vadd.f32 %v2642_v46, %v1069_v54  ;;  %v1151_v8 = vadd.f32 %v2644_v47, %v1070_v37  ;;  %v1152_v62 = vadd.f32 %v2646_v23, %v1071_v3  ;;  %v1153_v36 = vadd.f32 %v2649_v45, %v1072_v50  ;;  %v861_v3 = vpop.xlane.xlu2 %860  ;;  %v1219_v50 = vld [vmem:[#allocation5 + $0x88] sm:$0xff] }
 0x35f   :  { %v1274_v25 = vadd.f32 %v1210_v41, %v1146_v58  ;;  %v1275_v55 = vadd.f32 %v1211_v10, %v1147_v20  ;;  %v1276_v42 = vadd.f32 %v1212_v6, %v1148_v52  ;;  %v1277_v49 = vadd.f32 %v1213_v22, %v1149_v56  ;;  %v1221_v58 = vld [vmem:[#allocation5 + $0x98] sm:$0xff] }
 0x360   :  { %v1278_v61 = vadd.f32 %v1214_v63, %v1150_v33  ;;  %v921_v27 = vmul.f32 %v2673_v14, %v920_v24  ;;  %v927_v4 = vmul.f32 %v2712_v30, %v2684_v57  ;;  %v1279_v60 = vadd.f32 %v1215_v32, %v1151_v8  ;;  %v1222_v8 = vld [vmem:[#allocation5 + $0xa0] sm:$0xff] }
 0x361   :  { %1338 = vst [vmem:[#allocation7 + $0x40] sm:$0xff] %v1274_v25  ;;  %v1280_v17 = vadd.f32 %v1216_v12, %v1152_v62  ;;  %v1281_v13 = vadd.f32 %v1217_v31, %v1153_v36  ;;  %1523 = vrsqrt.f32 %v2717_v38  ;;  %v885_v12 = vmul.f32 %v861_v3, %v2273_v39  ;;  %v1223_v36 = vld [vmem:[#allocation5 + $0xa8] sm:$0xff] }
 0x362   :  { %1339 = vst [vmem:[#allocation7 + $0x48] sm:$0xff] %v1275_v55  ;;  %v925_v44 = vsel %vm924_vm4, %v2673_v14, %v921_v27  ;;  %v928_v34 = vmul.f32 %v2712_v30, %v927_v4  ;;  %vm933_vm5 = vweird.f32 %v2712_v30  ;;  %vm942_vm9 = vweird.f32 %v2717_v38 }
 0x363   :  { %1340 = vst [vmem:[#allocation7 + $0x50] sm:$0xff] %v1276_v42  ;;  %v992_v43 = vmul.f32 %v925_v44, %v2350_v11  ;;  %v993_v24 = vmul.f32 %v925_v44, %v2353_v59  ;;  %v994_v48 = vmul.f32 %v925_v44, %v2356_v5  ;;  %v995_v41 = vmul.f32 %v925_v44, %v2366_v15  ;;  %v1218_v15 = vld [vmem:[#allocation5 + $0x80] sm:$0xff]  ;;  %vm934_vm7 = vmor %vm932_vm6, %vm933_vm5 }
 0x364   :  { %1341 = vst [vmem:[#allocation7 + $0x58] sm:$0xff] %v1277_v49  ;;  %v996_v10 = vmul.f32 %v925_v44, %v2373_v29  ;;  %v997_v6 = vmul.f32 %v925_v44, %v2381_v53  ;;  %v998_v14 = vmul.f32 %v925_v44, %v2395_v16  ;;  %v999_v54 = vmul.f32 %v925_v44, %v2407_v28  ;;  %v1220_v29 = vld [vmem:[#allocation5 + $0x90] sm:$0xff] }
 0x365   :  { %1342 = vst [vmem:[#allocation7 + $0x60] sm:$0xff] %v1278_v61  ;;  %v1073_v37 = vmul.f32 %v2611_v18, %v992_v43  ;;  %v1074_v11 = vmul.f32 %v2613_v0, %v993_v24  ;;  %v1075_v59 = vmul.f32 %v2615_v21, %v994_v48  ;;  %v1076_v5 = vmul.f32 %v2617_v9, %v995_v41  ;;  %v870_v49 = vpop.xlane.xlu0 %869  ;;  %v1224_v61 = vld [vmem:[#allocation5 + $0xb0] sm:$0xff] }
 0x366   :  { %1343 = vst [vmem:[#allocation7 + $0x68] sm:$0xff] %v1279_v60  ;;  %v1077_v53 = vmul.f32 %v2619_v2, %v996_v10  ;;  %v1078_v16 = vmul.f32 %v2621_v26, %v997_v6  ;;  %v1079_v28 = vmul.f32 %v2623_v1, %v998_v14  ;;  %v1080_v22 = vmul.f32 %v2628_v19, %v999_v54  ;;  %v1225_v60 = vld [vmem:[#allocation5 + $0xb8] sm:$0xff] }
 0x367   :  { %1344 = vst [vmem:[#allocation7 + $0x70] sm:$0xff] %v1280_v17  ;;  %v1154_v20 = vadd.f32 %v2630_v51, %v1073_v37  ;;  %v1155_v52 = vadd.f32 %v2632_v7, %v1074_v11  ;;  %v1156_v56 = vadd.f32 %v2634_v35, %v1075_v59  ;;  %v1157_v63 = vadd.f32 %v2640_v40, %v1076_v5  ;;  %v2749_v33 = vpop.eup %1523 }
 0x368   :  { %1345 = vst [vmem:[#allocation7 + $0x78] sm:$0xff] %v1281_v13  ;;  %v1158_v62 = vadd.f32 %v2642_v46, %v1077_v53  ;;  %v1159_v32 = vadd.f32 %v2644_v47, %v1078_v16  ;;  %v1160_v25 = vadd.f32 %v2646_v23, %v1079_v28  ;;  %v1161_v27 = vadd.f32 %v2649_v45, %v1080_v22  ;;  %v3091_v53 = vld [vmem:[#allocation31_spill] sm:$0xff] }
 0x369   :  { %v1282_v55 = vadd.f32 %v1218_v15, %v1154_v20  ;;  %v1283_v42 = vadd.f32 %v1219_v50, %v1155_v52  ;;  %v1284_v31 = vadd.f32 %v1220_v29, %v1156_v56  ;;  %v1285_v4 = vadd.f32 %v1221_v58, %v1157_v63  ;;  %v3089_v15 = vld [vmem:[#allocation29_spill] sm:$0xff]  ;;  %v3090_v29 = vld [vmem:[#allocation30_spill] sm:$0xff]  ;;  %v3092_v28 = vld [vmem:[#allocation11_spill] sm:$0xff] }
 0x36a   :  { %v1286_v17 = vadd.f32 %v1222_v8, %v1158_v62  ;;  %v929_v13 = vmul.f32 0.5, %v928_v34  ;;  %v937_v44 = vmul.f32 %v2749_v33, %v2717_v38  ;;  %v1287_v43 = vadd.f32 %v1223_v36, %v1159_v32  ;;  %v3093_v58 = vld [vmem:[#allocation32_spill] sm:$0xff]  ;;  %v3094_v52 = vld [vmem:[#allocation33_spill] sm:$0xff]  ;;  %v3095_v63 = vld [vmem:[#allocation34_spill] sm:$0xff] }
 0x36b   :  { %1346 = vst [vmem:[#allocation7 + $0x80] sm:$0xff] %v1282_v55  ;;  %v2758_v24 = vadd.f32 1e-05, %v885_v12  ;;  %v886_v48 = vmul.f32 %v870_v49, %v2273_v39  ;;  %v1288_v41 = vadd.f32 %v1224_v61, %v1160_v25  ;;  %v1289_v14 = vadd.f32 %v1225_v60, %v1161_v27  ;;  %v3096_v8 = vld [vmem:[#allocation35_spill] sm:$0xff]  ;;  %v1227_v55 = vld [vmem:[#allocation5 + $0xc8] sm:$0xff]  ;;  %v1229_v60 = vld [vmem:[#allocation5 + $0xd8] sm:$0xff] }
 0x36c   :  { %1347 = vst [vmem:[#allocation7 + $0x88] sm:$0xff] %v1283_v42  ;;  %v930_v10 = vsub.f32 1.5, %v929_v13  ;;  %v938_v6 = vmul.f32 %v2749_v33, %v937_v44  ;;  %v879_v34 = vpop.xlane.xlu1 %878  ;;  %vm943_vm8 = vweird.f32 %v2749_v33  ;;  %v1226_v25 = vld [vmem:[#allocation5 + $0xc0] sm:$0xff]  ;;  %v1228_v42 = vld [vmem:[#allocation5 + $0xd0] sm:$0xff] }
 0x36d   :  { %1348 = vst [vmem:[#allocation7 + $0x90] sm:$0xff] %v1284_v31  ;;  %v2763_v54 = vadd.f32 1e-05, %v886_v48  ;;  %1525 = vrsqrt.f32 %v2758_v24  ;;  %v887_v3 = vmul.f32 %v879_v34, %v2273_v39  ;;  %vm944_vm10 = vmor %vm942_vm9, %vm943_vm8  ;;  %vm952_vm12 = vweird.f32 %v2758_v24 }
 0x36e   :  { %1349 = vst [vmem:[#allocation7 + $0x98] sm:$0xff] %v1285_v4  ;;  %v931_v37 = vmul.f32 %v2712_v30, %v930_v10  ;;  %v939_v11 = vmul.f32 0.5, %v938_v6 }
 0x36f   :  { %1350 = vst [vmem:[#allocation7 + $0xa0] sm:$0xff] %v1286_v17  ;;  %1527 = vrsqrt.f32 %v2763_v54  ;;  %vm962_vm14 = vweird.f32 %v2763_v54 }
 0x370   :  { %1351 = vst [vmem:[#allocation7 + $0xa8] sm:$0xff] %v1287_v43  ;;  %v935_v59 = vsel %vm934_vm7, %v2712_v30, %v931_v37  ;;  %v940_v5 = vsub.f32 1.5, %v939_v11  ;;  %v1231_v37 = vld [vmem:[#allocation5 + $0xe8] sm:$0xff]  ;;  %v1232_v11 = vld [vmem:[#allocation5 + $0xf0] sm:$0xff] }
 0x371   :  { %1352 = vst [vmem:[#allocation7 + $0xb0] sm:$0xff] %v1288_v41  ;;  %v1000_v50 = vmul.f32 %v935_v59, %v3089_v15  ;;  %v1001_v57 = vmul.f32 %v935_v59, %v3090_v29  ;;  %v1002_v16 = vmul.f32 %v935_v59, %v3091_v53  ;;  %v1003_v22 = vmul.f32 %v935_v59, %v3092_v28  ;;  %v1230_v41 = vld [vmem:[#allocation5 + $0xe0] sm:$0xff] }
 0x372   :  { %1353 = vst [vmem:[#allocation7 + $0xb8] sm:$0xff] %v1289_v14  ;;  %v1004_v20 = vmul.f32 %v935_v59, %v3093_v58  ;;  %v1005_v56 = vmul.f32 %v935_v59, %v3094_v52  ;;  %v1006_v30 = vmul.f32 %v935_v59, %v3095_v63  ;;  %v1007_v62 = vmul.f32 %v935_v59, %v3096_v8  ;;  %v1233_v59 = vld [vmem:[#allocation5 + $0xf8] sm:$0xff]  ;;  %v3097_v63 = vld [vmem:[#allocation12_spill] sm:$0xff]  ;;  %v3098_v8 = vld [vmem:[#allocation13_spill] sm:$0xff] }
 0x373   :  { %v1081_v32 = vmul.f32 %v2611_v18, %v1000_v50  ;;  %v1082_v39 = vmul.f32 %v2613_v0, %v1001_v57  ;;  %v1083_v12 = vmul.f32 %v2615_v21, %v1002_v16  ;;  %v1084_v36 = vmul.f32 %v2617_v9, %v1003_v22  ;;  %v2788_v4 = vpop.eup %1525 }
 0x374   :  { %v1085_v31 = vmul.f32 %v2619_v2, %v1004_v20  ;;  %v1086_v49 = vmul.f32 %v2621_v26, %v1005_v56  ;;  %v1087_v61 = vmul.f32 %v2623_v1, %v1006_v30  ;;  %v1088_v27 = vmul.f32 %v2628_v19, %v1007_v62 }
 0x375   :  { %v1162_v17 = vadd.f32 %v2630_v51, %v1081_v32  ;;  %v1163_v13 = vadd.f32 %v2632_v7, %v1082_v39  ;;  %v1164_v44 = vadd.f32 %v2634_v35, %v1083_v12  ;;  %v1165_v43 = vadd.f32 %v2640_v40, %v1084_v36  ;;  %v2794_v48 = vpop.eup %1527  ;;  %v3099_v32 = vld [vmem:[#allocation14_spill] sm:$0xff]  ;;  %v3100_v12 = vld [vmem:[#allocation15_spill] sm:$0xff] }
 0x376   :  { %v1166_v10 = vadd.f32 %v2642_v46, %v1085_v31  ;;  %v1167_v6 = vadd.f32 %v2644_v47, %v1086_v49  ;;  %v1168_v14 = vadd.f32 %v2646_v23, %v1087_v61  ;;  %v1169_v34 = vadd.f32 %v2649_v45, %v1088_v27  ;;  %v3103_v31 = vld [vmem:[#allocation38_spill] sm:$0xff]  ;;  %v3104_v61 = vld [vmem:[#allocation39_spill] sm:$0xff] }
 0x377   :  { %v1290_v15 = vadd.f32 %v1226_v25, %v1162_v17  ;;  %v1291_v50 = vadd.f32 %v1227_v55, %v1163_v13  ;;  %v1292_v29 = vadd.f32 %v1228_v42, %v1164_v44  ;;  %v2800_v57 = vadd.f32 1e-05, %v887_v3  ;;  %v3101_v25 = vld [vmem:[#allocation36_spill] sm:$0xff]  ;;  %v3102_v42 = vld [vmem:[#allocation37_spill] sm:$0xff] }
 0x378   :  { %v1293_v53 = vadd.f32 %v1229_v60, %v1165_v43  ;;  %v1294_v16 = vadd.f32 %v1230_v41, %v1166_v10  ;;  %v941_v28 = vmul.f32 %v2749_v33, %v940_v5  ;;  %v947_v22 = vmul.f32 %v2788_v4, %v2758_v24  ;;  %v1234_v43 = vld [vmem:[#allocation5 + $0x100] sm:$0xff]  ;;  %v1235_v41 = vld [vmem:[#allocation5 + $0x108] sm:$0xff]  ;;  %v1236_v10 = vld [vmem:[#allocation5 + $0x110] sm:$0xff] }
 0x379   :  { %1354 = vst [vmem:[#allocation7 + $0xc0] sm:$0xff] %v1290_v15  ;;  %v957_v58 = vmul.f32 %v2794_v48, %v2763_v54  ;;  %v1295_v20 = vadd.f32 %v1231_v37, %v1167_v6  ;;  %v1296_v52 = vadd.f32 %v1232_v11, %v1168_v14  ;;  %v1297_v56 = vadd.f32 %v1233_v59, %v1169_v34  ;;  %v1237_v11 = vld [vmem:[#allocation5 + $0x118] sm:$0xff] }
 0x37a   :  { %1355 = vst [vmem:[#allocation7 + $0xc8] sm:$0xff] %v1291_v50  ;;  %v945_v38 = vsel %vm944_vm10, %v2749_v33, %v941_v28  ;;  %v948_v3 = vmul.f32 %v2788_v4, %v947_v22  ;;  %1529 = vrsqrt.f32 %v2800_v57  ;;  %vm953_vm0 = vweird.f32 %v2788_v4 }
 0x37b   :  { %1356 = vst [vmem:[#allocation7 + $0xd0] sm:$0xff] %v1292_v29  ;;  %v958_v5 = vmul.f32 %v2794_v48, %v957_v58  ;;  %v1008_v30 = vmul.f32 %v945_v38, %v3097_v63  ;;  %v1009_v62 = vmul.f32 %v945_v38, %v3098_v8  ;;  %v1010_v39 = vmul.f32 %v945_v38, %v3099_v32  ;;  %v1239_v58 = vld [vmem:[#allocation5 + $0x128] sm:$0xff]  ;;  %v1240_v63 = vld [vmem:[#allocation5 + $0x130] sm:$0xff]  ;;  %vm954_vm13 = vmor %vm952_vm12, %vm953_vm0 }
 0x37c   :  { %1357 = vst [vmem:[#allocation7 + $0xd8] sm:$0xff] %v1293_v53  ;;  %v1011_v36 = vmul.f32 %v945_v38, %v3100_v12  ;;  %v1012_v55 = vmul.f32 %v945_v38, %v3101_v25  ;;  %v1013_v33 = vmul.f32 %v945_v38, %v3102_v42  ;;  %v1014_v49 = vmul.f32 %v945_v38, %v3103_v31 }
 0x37d   :  { %1358 = vst [vmem:[#allocation7 + $0xe0] sm:$0xff] %v1294_v16  ;;  %v1015_v27 = vmul.f32 %v945_v38, %v3104_v61  ;;  %v1089_v60 = vmul.f32 %v2611_v18, %v1008_v30  ;;  %v1090_v17 = vmul.f32 %v2613_v0, %v1009_v62  ;;  %v1091_v13 = vmul.f32 %v2615_v21, %v1010_v39  ;;  %v1238_v16 = vld [vmem:[#allocation5 + $0x120] sm:$0xff]  ;;  %v1241_v62 = vld [vmem:[#allocation5 + $0x138] sm:$0xff] }
 0x37e   :  { %1359 = vst [vmem:[#allocation7 + $0xe8] sm:$0xff] %v1295_v20  ;;  %v1092_v44 = vmul.f32 %v2617_v9, %v1011_v36  ;;  %v1093_v6 = vmul.f32 %v2619_v2, %v1012_v55  ;;  %v1094_v14 = vmul.f32 %v2621_v26, %v1013_v33  ;;  %v1095_v34 = vmul.f32 %v2623_v1, %v1014_v49 }
 0x37f   :  { %1360 = vst [vmem:[#allocation7 + $0xf0] sm:$0xff] %v1296_v52  ;;  %v1096_v37 = vmul.f32 %v2628_v19, %v1015_v27  ;;  %v1170_v59 = vadd.f32 %v2630_v51, %v1089_v60  ;;  %v1171_v15 = vadd.f32 %v2632_v7, %v1090_v17  ;;  %v1172_v50 = vadd.f32 %v2634_v35, %v1091_v13  ;;  %v3105_v17 = vld [vmem:[#allocation16_spill] sm:$0xff] }
 0x380   :  { %1361 = vst [vmem:[#allocation7 + $0xf8] sm:$0xff] %v1297_v56  ;;  %v1173_v29 = vadd.f32 %v2640_v40, %v1092_v44  ;;  %v2834_v53 = vpop.eup %1529  ;;  %v1174_v28 = vadd.f32 %v2642_v46, %v1093_v6  ;;  %v1175_v22 = vadd.f32 %v2644_v47, %v1094_v14  ;;  %v1176_v20 = vadd.f32 %v2646_v23, %v1095_v34  ;;  %v3106_v44 = vld [vmem:[#allocation17_spill] sm:$0xff]  ;;  %v3109_v14 = vld [vmem:[#allocation40_spill] sm:$0xff] }
 0x381   :  { %v1298_v52 = vadd.f32 %v1234_v43, %v1170_v59  ;;  %v1299_v56 = vadd.f32 %v1235_v41, %v1171_v15  ;;  %v1300_v38 = vadd.f32 %v1236_v10, %v1172_v50  ;;  %v1177_v30 = vadd.f32 %v2649_v45, %v1096_v37  ;;  %v3107_v41 = vld [vmem:[#allocation18_spill] sm:$0xff]  ;;  %v3108_v10 = vld [vmem:[#allocation19_spill] sm:$0xff]  ;;  %v3110_v37 = vld [vmem:[#allocation41_spill] sm:$0xff] }
 0x382   :  { %v1301_v8 = vadd.f32 %v1237_v11, %v1173_v29  ;;  %v1302_v32 = vadd.f32 %v1238_v16, %v1174_v28  ;;  %v949_v39 = vmul.f32 0.5, %v948_v3  ;;  %v959_v12 = vmul.f32 0.5, %v958_v5  ;;  %v3111_v59 = vld [vmem:[#allocation42_spill] sm:$0xff]  ;;  %v1243_v29 = vld [vmem:[#allocation5 + $0x148] sm:$0xff] }
 0x383   :  { %1362 = vst [vmem:[#allocation7 + $0x100] sm:$0xff] %v1298_v52  ;;  %v967_v36 = vmul.f32 %v2834_v53, %v2800_v57  ;;  %v1303_v25 = vadd.f32 %v1239_v58, %v1175_v22  ;;  %vm963_vm11 = vweird.f32 %v2794_v48  ;;  %v1304_v55 = vadd.f32 %v1240_v63, %v1176_v20  ;;  %v1244_v20 = vld [vmem:[#allocation5 + $0x150] sm:$0xff]  ;;  %v1245_v52 = vld [vmem:[#allocation5 + $0x158] sm:$0xff] }
 0x384   :  { %1363 = vst [vmem:[#allocation7 + $0x108] sm:$0xff] %v1299_v56  ;;  %v950_v42 = vsub.f32 1.5, %v949_v39  ;;  %v960_v33 = vsub.f32 1.5, %v959_v12  ;;  %v1305_v49 = vadd.f32 %v1241_v62, %v1177_v30  ;;  %vm964_vm15 = vmor %vm962_vm14, %vm963_vm11  ;;  %v1246_v56 = vld [vmem:[#allocation5 + $0x160] sm:$0xff]  ;;  %v1247_v62 = vld [vmem:[#allocation5 + $0x168] sm:$0xff]  ;;  %vm973_vm1 = vweird.f32 %v2834_v53 }
 0x385   :  { %1364 = vst [vmem:[#allocation7 + $0x110] sm:$0xff] %v1300_v38  ;;  %v968_v31 = vmul.f32 %v2834_v53, %v967_v36  ;;  %v1249_v39 = vld [vmem:[#allocation5 + $0x178] sm:$0xff]  ;;  %vm972_vm2 = vweird.f32 %v2800_v57  ;;  %v3125_v57 = vld [vmem:[#allocation24_spill] sm:$0xff] }
 0x386   :  { %1365 = vst [vmem:[#allocation7 + $0x118] sm:$0xff] %v1301_v8  ;;  %v951_v3 = vmul.f32 %v2788_v4, %v950_v42  ;;  %v961_v5 = vmul.f32 %v2794_v48, %v960_v33  ;;  %vm974_vm3 = vmor %vm972_vm2, %vm973_vm1 }
 0x387   :  { %1366 = vst [vmem:[#allocation7 + $0x120] sm:$0xff] %v1302_v32  ;;  %v2849_v61 = vmul.f32 0.5, %v968_v31  ;;  %v1248_v32 = vld [vmem:[#allocation5 + $0x170] sm:$0xff] }
 0x388   :  { %1367 = vst [vmem:[#allocation7 + $0x128] sm:$0xff] %v1303_v25  ;;  %v955_v27 = vsel %vm954_vm13, %v2788_v4, %v951_v3  ;;  %v965_v60 = vsel %vm964_vm15, %v2794_v48, %v961_v5  ;;  %v3112_v4 = vld [vmem:[#allocation45_spill] sm:$0xff]  ;;  %v1242_v48 = vld [vmem:[#allocation5 + $0x140] sm:$0xff] }
 0x389   :  { %1368 = vst [vmem:[#allocation7 + $0x130] sm:$0xff] %v1304_v55  ;;  %v970_v24 = vsub.f32 1.5, %v2849_v61  ;;  %v1016_v13 = vmul.f32 %v955_v27, %v3105_v17  ;;  %v1017_v43 = vmul.f32 %v955_v27, %v3106_v44  ;;  %v1018_v54 = vmul.f32 %v955_v27, %v3107_v41  ;;  %v3123_v61 = vld [vmem:[#allocation23_spill] sm:$0xff] }
 0x38a   :  { %1369 = vst [vmem:[#allocation7 + $0x138] sm:$0xff] %v1305_v49  ;;  %v1019_v6 = vmul.f32 %v955_v27, %v3108_v10  ;;  %v1020_v34 = vmul.f32 %v955_v27, %v3109_v14  ;;  %v1021_v11 = vmul.f32 %v955_v27, %v3110_v37  ;;  %v1022_v15 = vmul.f32 %v955_v27, %v3111_v59 }
 0x38b   :  { %v1023_v50 = vmul.f32 %v955_v27, %v3112_v4  ;;  %v1097_v16 = vmul.f32 %v2611_v18, %v1016_v13  ;;  %v1098_v28 = vmul.f32 %v2613_v0, %v1017_v43  ;;  %v1099_v22 = vmul.f32 %v2615_v21, %v1018_v54  ;;  %v3113_v54 = vld [vmem:[#allocation43_spill] sm:$0xff] }
 0x38c   :  { %v1100_v58 = vmul.f32 %v2617_v9, %v1019_v6  ;;  %v1101_v38 = vmul.f32 %v2619_v2, %v1020_v34  ;;  %v1102_v63 = vmul.f32 %v2621_v26, %v1021_v11  ;;  %v1103_v30 = vmul.f32 %v2623_v1, %v1022_v15  ;;  %v3114_v6 = vld [vmem:[#allocation44_spill] sm:$0xff]  ;;  %v3116_v11 = vld [vmem:[#allocation46_spill] sm:$0xff]  ;;  %v3117_v15 = vld [vmem:[#allocation47_spill] sm:$0xff] }
 0x38d   :  { %v1104_v8 = vmul.f32 %v2628_v19, %v1023_v50  ;;  %v1178_v12 = vadd.f32 %v2630_v51, %v1097_v16  ;;  %v1179_v36 = vadd.f32 %v2632_v7, %v1098_v28  ;;  %v1180_v25 = vadd.f32 %v2634_v35, %v1099_v22  ;;  %v3115_v34 = vld [vmem:[#allocation20_spill] sm:$0xff]  ;;  %v3120_v28 = vld [vmem:[#allocation51_spill] sm:$0xff] }
 0x38e   :  { %v1181_v55 = vadd.f32 %v2640_v40, %v1100_v58  ;;  %v1182_v42 = vadd.f32 %v2642_v46, %v1101_v38  ;;  %v1183_v33 = vadd.f32 %v2644_v47, %v1102_v63  ;;  %v1184_v31 = vadd.f32 %v2646_v23, %v1103_v30  ;;  %v3118_v50 = vld [vmem:[#allocation48_spill] sm:$0xff]  ;;  %v1250_v38 = vld [vmem:[#allocation5 + $0x180] sm:$0xff]  ;;  %v1252_v30 = vld [vmem:[#allocation5 + $0x190] sm:$0xff] }
 0x38f   :  { %v1185_v49 = vadd.f32 %v2649_v45, %v1104_v8  ;;  %v1306_v3 = vadd.f32 %v1242_v48, %v1178_v12  ;;  %v1307_v5 = vadd.f32 %v1243_v29, %v1179_v36  ;;  %v1308_v27 = vadd.f32 %v1244_v20, %v1180_v25  ;;  %v3119_v29 = vld [vmem:[#allocation49_spill] sm:$0xff]  ;;  %v1251_v63 = vld [vmem:[#allocation5 + $0x188] sm:$0xff] }
 0x390   :  { %v1309_v17 = vadd.f32 %v1245_v52, %v1181_v55  ;;  %v1310_v13 = vadd.f32 %v1246_v56, %v1182_v42  ;;  %v1311_v44 = vadd.f32 %v1247_v62, %v1183_v33  ;;  %v1312_v43 = vadd.f32 %v1248_v32, %v1184_v31  ;;  %v1254_v42 = vld [vmem:[#allocation5 + $0x1a0] sm:$0xff] }
 0x391   :  { %v1313_v41 = vadd.f32 %v1249_v39, %v1185_v49  ;;  %1370 = vst [vmem:[#allocation7 + $0x140] sm:$0xff] %v1306_v3  ;;  %v1024_v10 = vmul.f32 %v965_v60, %v3113_v54  ;;  %v1025_v14 = vmul.f32 %v965_v60, %v3114_v6  ;;  %v1026_v37 = vmul.f32 %v965_v60, %v3115_v34  ;;  %v1253_v39 = vld [vmem:[#allocation5 + $0x198] sm:$0xff]  ;;  %v1255_v3 = vld [vmem:[#allocation5 + $0x1a8] sm:$0xff]  ;;  %v1256_v54 = vld [vmem:[#allocation5 + $0x1b0] sm:$0xff] }
 0x392   :  { %v1027_v59 = vmul.f32 %v965_v60, %v3116_v11  ;;  %1371 = vst [vmem:[#allocation7 + $0x148] sm:$0xff] %v1307_v5  ;;  %v1028_v4 = vmul.f32 %v965_v60, %v3117_v15  ;;  %v1029_v48 = vmul.f32 %v965_v60, %v3118_v50  ;;  %v1030_v16 = vmul.f32 %v965_v60, %v3119_v29  ;;  %v3121_v11 = vld [vmem:[#allocation21_spill] sm:$0xff]  ;;  %v3122_v15 = vld [vmem:[#allocation22_spill] sm:$0xff] }
 0x393   :  { %v1031_v22 = vmul.f32 %v965_v60, %v3120_v28  ;;  %1372 = vst [vmem:[#allocation7 + $0x150] sm:$0xff] %v1308_v27  ;;  %v1105_v58 = vmul.f32 %v2611_v18, %v1024_v10  ;;  %v1106_v20 = vmul.f32 %v2613_v0, %v1025_v14  ;;  %v1107_v52 = vmul.f32 %v2615_v21, %v1026_v37  ;;  %v1257_v10 = vld [vmem:[#allocation5 + $0x1b8] sm:$0xff] }
 0x394   :  { %v1108_v56 = vmul.f32 %v2617_v9, %v1027_v59  ;;  %1373 = vst [vmem:[#allocation7 + $0x158] sm:$0xff] %v1309_v17  ;;  %v1109_v8 = vmul.f32 %v2619_v2, %v1028_v4  ;;  %v1110_v62 = vmul.f32 %v2621_v26, %v1029_v48  ;;  %v1111_v32 = vmul.f32 %v2623_v1, %v1030_v16  ;;  %v3126_v16 = vld [vmem:[#allocation52_spill] sm:$0xff] }
 0x395   :  { %v1112_v60 = vmul.f32 %v2628_v19, %v1031_v22  ;;  %1374 = vst [vmem:[#allocation7 + $0x160] sm:$0xff] %v1310_v13  ;;  %v1186_v12 = vadd.f32 %v2630_v51, %v1105_v58  ;;  %v1187_v36 = vadd.f32 %v2632_v7, %v1106_v20  ;;  %v1188_v25 = vadd.f32 %v2634_v35, %v1107_v52  ;;  %v3127_v22 = vld [vmem:[#allocation53_spill] sm:$0xff]  ;;  %v3128_v20 = vld [vmem:[#allocation54_spill] sm:$0xff] }
 0x396   :  { %v1189_v55 = vadd.f32 %v2640_v40, %v1108_v56  ;;  %1375 = vst [vmem:[#allocation7 + $0x168] sm:$0xff] %v1311_v44  ;;  %v1190_v33 = vadd.f32 %v2642_v46, %v1109_v8  ;;  %v1191_v31 = vadd.f32 %v2644_v47, %v1110_v62  ;;  %v1192_v49 = vadd.f32 %v2646_v23, %v1111_v32  ;;  %v1259_v8 = vld [vmem:[#allocation5 + $0x1c8] sm:$0xff]  ;;  %v1260_v62 = vld [vmem:[#allocation5 + $0x1d0] sm:$0xff] }
 0x397   :  { %1376 = vst [vmem:[#allocation7 + $0x170] sm:$0xff] %v1312_v43  ;;  %v1193_v5 = vadd.f32 %v2649_v45, %v1112_v60  ;;  %v1314_v27 = vadd.f32 %v1250_v38, %v1186_v12  ;;  %v1315_v17 = vadd.f32 %v1251_v63, %v1187_v36  ;;  %v1316_v13 = vadd.f32 %v1252_v30, %v1188_v25  ;;  %v1258_v30 = vld [vmem:[#allocation5 + $0x1c0] sm:$0xff] }
 0x398   :  { %1377 = vst [vmem:[#allocation7 + $0x178] sm:$0xff] %v1313_v41  ;;  %v1317_v44 = vadd.f32 %v1253_v39, %v1189_v55  ;;  %v1318_v6 = vadd.f32 %v1254_v42, %v1190_v33  ;;  %v971_v14 = vmul.f32 %v2834_v53, %v970_v24  ;;  %v1319_v34 = vadd.f32 %v1255_v3, %v1191_v31  ;;  %v3124_v24 = vld [vmem:[#allocation50_spill] sm:$0xff]  ;;  %v1262_v25 = vld [vmem:[#allocation5 + $0x1e0] sm:$0xff]  ;;  %v1264_v31 = vld [vmem:[#allocation5 + $0x1f0] sm:$0xff] }
 0x399   :  { %1378 = vst [vmem:[#allocation7 + $0x180] sm:$0xff] %v1314_v27  ;;  %v1320_v43 = vadd.f32 %v1256_v54, %v1192_v49  ;;  %v1321_v37 = vadd.f32 %v1257_v10, %v1193_v5 }
 0x39a   :  { %1379 = vst [vmem:[#allocation7 + $0x188] sm:$0xff] %v1315_v17  ;;  %v975_v41 = vsel %vm974_vm3, %v2834_v53, %v971_v14 }
 0x39b   :  { %1380 = vst [vmem:[#allocation7 + $0x190] sm:$0xff] %v1316_v13  ;;  %v1032_v59 = vmul.f32 %v975_v41, %v3121_v11  ;;  %v1033_v4 = vmul.f32 %v975_v41, %v3122_v15  ;;  %v1034_v50 = vmul.f32 %v975_v41, %v3123_v61  ;;  %v1035_v48 = vmul.f32 %v975_v41, %v3124_v24 }
 0x39c   :  { %1381 = vst [vmem:[#allocation7 + $0x198] sm:$0xff] %v1317_v44  ;;  %v1036_v29 = vmul.f32 %v975_v41, %v3125_v57  ;;  %v1037_v28 = vmul.f32 %v975_v41, %v3126_v16  ;;  %v1038_v58 = vmul.f32 %v975_v41, %v3127_v22  ;;  %v1039_v52 = vmul.f32 %v975_v41, %v3128_v20 }
 0x39d   :  { %1382 = vst [vmem:[#allocation7 + $0x1a0] sm:$0xff] %v1318_v6  ;;  %v1113_v53 = vmul.f32 %v2611_v18, %v1032_v59  ;;  %v1114_v56 = vmul.f32 %v2613_v0, %v1033_v4  ;;  %v1115_v38 = vmul.f32 %v2615_v21, %v1034_v50  ;;  %v1116_v63 = vmul.f32 %v2617_v9, %v1035_v48  ;;  %v1261_v18 = vld [vmem:[#allocation5 + $0x1d8] sm:$0xff] }
 0x39e   :  { %1383 = vst [vmem:[#allocation7 + $0x1a8] sm:$0xff] %v1319_v34  ;;  %v1117_v32 = vmul.f32 %v2619_v2, %v1036_v29  ;;  %v1118_v60 = vmul.f32 %v2621_v26, %v1037_v28  ;;  %v1119_v39 = vmul.f32 %v2623_v1, %v1038_v58  ;;  %v1120_v12 = vmul.f32 %v2628_v19, %v1039_v52  ;;  %v1263_v26 = vld [vmem:[#allocation5 + $0x1e8] sm:$0xff] }
 0x39f   :  { %1384 = vst [vmem:[#allocation7 + $0x1b0] sm:$0xff] %v1320_v43  ;;  %v1194_v0 = vadd.f32 %v2630_v51, %v1113_v53  ;;  %v1195_v21 = vadd.f32 %v2632_v7, %v1114_v56  ;;  %v1196_v9 = vadd.f32 %v2634_v35, %v1115_v38  ;;  %v1197_v36 = vadd.f32 %v2640_v40, %v1116_v63  ;;  %v1265_v7 = vld [vmem:[#allocation5 + $0x1f8] sm:$0xff] }
 0x3a0   :  { %1385 = vst [vmem:[#allocation7 + $0x1b8] sm:$0xff] %v1321_v37  ;;  %v1198_v55 = vadd.f32 %v2642_v46, %v1117_v32  ;;  %v1199_v2 = vadd.f32 %v2644_v47, %v1118_v60  ;;  %v1200_v1 = vadd.f32 %v2646_v23, %v1119_v39  ;;  %v1201_v51 = vadd.f32 %v2649_v45, %v1120_v12 }
 0x3a1   :  { %v1322_v42 = vadd.f32 %v1258_v30, %v1194_v0  ;;  %v1323_v19 = vadd.f32 %v1259_v8, %v1195_v21  ;;  %v1324_v33 = vadd.f32 %v1260_v62, %v1196_v9  ;;  %v1325_v49 = vadd.f32 %v1261_v18, %v1197_v36 }
 0x3a2   :  { %v1326_v3 = vadd.f32 %v1262_v25, %v1198_v55  ;;  %v1327_v35 = vadd.f32 %v1263_v26, %v1199_v2  ;;  %v1328_v40 = vadd.f32 %v1264_v31, %v1200_v1  ;;  %v1329_v47 = vadd.f32 %v1265_v7, %v1201_v51 }
 0x3a3   :  { %1386 = vst [vmem:[#allocation7 + $0x1c0] sm:$0xff] %v1322_v42 }
 0x3a4   :  { %1387 = vst [vmem:[#allocation7 + $0x1c8] sm:$0xff] %v1323_v19 }
 0x3a5   :  { %1388 = vst [vmem:[#allocation7 + $0x1d0] sm:$0xff] %v1324_v33 }
 0x3a6   :  { %1389 = vst [vmem:[#allocation7 + $0x1d8] sm:$0xff] %v1325_v49 }
 0x3a7   :  { %1390 = vst [vmem:[#allocation7 + $0x1e0] sm:$0xff] %v1326_v3 }
 0x3a8   :  { %1391 = vst [vmem:[#allocation7 + $0x1e8] sm:$0xff] %v1327_v35 }
 0x3a9   :  { %1392 = vst [vmem:[#allocation7 + $0x1f0] sm:$0xff] %v1328_v40 }
 0x3aa   :  { %1393 = vst [vmem:[#allocation7 + $0x1f8] sm:$0xff] %v1329_v47 }
 0x3ab   :  { %1406 = dma.vmem_to_hbm [thread:$0]  %s1399_s21, 8192, %s1401_s24, [#allocation4], %s1611_s15, %s1611_s15, %s1612_s16  }
 0x3ac   :  { %1607 = dma.done.wait [#allocation4], 8192  }
 0x3ad   :  { %1608 = vsyncadd [#allocation4], 4294959104 }
 0x3ae   :  { %1411 = vsyncpa [#allocation3], 1 }
 0x3af   :  { %1412 = vsyncpa [#allocation6], 1 }
 0x3b0   :  { %1413 = vsyncpa [#allocation4], 1 }

</bundles_post_ra>
